<compile_context>
chip_gen: v7x
topology: tpu7x:2x2x1
jax: 0.10.0
libtpu: 0.0.40
codegen_flags: <defaults>
</compile_context>

<pallas_src>
import functools

import jax
import jax.numpy as jnp
from jax.experimental import pallas as pl
from jax.experimental.pallas import tpu as pltpu


# ---------------------------------------------------------------------------
# Fused, batched Pallas kernel:
#   query GIN + data GIN + per-graph sum-pool + 3-layer MLP head
# ---------------------------------------------------------------------------
def count_net_kernel(q_adj_ref, q_x_ref, d_adj_ref, d_x_ref,
                     qw_ref, qb_ref, dw_ref, db_ref,
                     hw_ref, hb_ref, o_ref,
                     *, q_hid, d_hid, out_dim):

    def gin_pool(adj_ref, x_ref, w_ref, b_ref, hid):
        adj = adj_ref[...]                          # (PB, N, N)  bf16  (= A + I)
        x = x_ref[...]                              # (PB, N, F)  bf16
        pb, n, f = x.shape
        # --- GINConv 1: MLP((A + I) @ x), eps = 0 -------------------------
        agg = jnp.einsum('bnm,bmf->bnf', adj, x,
                         preferred_element_type=jnp.float32)        # (PB,N,F) f32
        h = jnp.dot(agg.reshape(pb * n, f).astype(jnp.bfloat16),
                    w_ref[0, :f, :hid], preferred_element_type=jnp.float32)
        h = jnp.maximum(h + b_ref[0:1, :hid], 0.0)
        h = jnp.dot(h.astype(jnp.bfloat16), w_ref[1, :hid, :hid],
                    preferred_element_type=jnp.float32)
        h = jnp.maximum(h + b_ref[1:2, :hid], 0.0)
        # --- GINConv 2 -----------------------------------------------------
        agg = jnp.einsum('bnm,bmf->bnf', adj,
                         h.reshape(pb, n, hid).astype(jnp.bfloat16),
                         preferred_element_type=jnp.float32)
        h = jnp.dot(agg.reshape(pb * n, hid).astype(jnp.bfloat16),
                    w_ref[2, :hid, :hid], preferred_element_type=jnp.float32)
        h = jnp.maximum(h + b_ref[2:3, :hid], 0.0)
        h = jnp.dot(h.astype(jnp.bfloat16), w_ref[3, :hid, :out_dim],
                    preferred_element_type=jnp.float32)
        h = jnp.maximum(h + b_ref[3:4, :out_dim], 0.0)
        # --- global sum-pool per graph (batch vector is all-zeros) ---------
        return jnp.sum(h.reshape(pb, n, out_dim), axis=1)           # (PB,out) f32

    q_pool = gin_pool(q_adj_ref, q_x_ref, qw_ref, qb_ref, q_hid)
    d_pool = gin_pool(d_adj_ref, d_x_ref, dw_ref, db_ref, d_hid)

    half = out_dim // 2
    # Head layer 1: Linear(2*out_dim, out_dim) on concat([q_pool, d_pool]),
    # rewritten as a split matmul so no concat is needed.
    h = (jnp.dot(q_pool.astype(jnp.bfloat16), hw_ref[0, :, :],
                 preferred_element_type=jnp.float32)
         + jnp.dot(d_pool.astype(jnp.bfloat16), hw_ref[1, :, :],
                   preferred_element_type=jnp.float32)
         + hb_ref[0:1, :out_dim])
    h = jnp.maximum(h, 0.0)
    # Head layer 2: Linear(out_dim, out_dim // 2) + ReLU
    h = jnp.dot(h.astype(jnp.bfloat16), hw_ref[2, :, :half],
                preferred_element_type=jnp.float32) + hb_ref[1:2, :half]
    h = jnp.maximum(h, 0.0)
    # Head layer 3: Linear(out_dim // 2, 1) + ReLU done on the VPU/XLU
    # (a (PB,8)@(8,1) MXU matmul would pay a full push/pop for one column).
    w3 = hw_ref[3, 0:1, :half].astype(jnp.float32)                   # (1, half)
    y = jnp.sum(h * w3, axis=-1, keepdims=True) + hb_ref[2:3, 0:1]   # (PB, 1)
    y = jnp.maximum(y, 0.0)
    # Lane-dense store; wrapper slices column 0.
    o_ref[...] = jnp.broadcast_to(y, o_ref.shape)


# ---------------------------------------------------------------------------
# Parameter slab packing (trace-time; slashes DMA descriptor count 25 -> 10)
# ---------------------------------------------------------------------------
def pack_gin_params(p, in_dim, hid, out_dim):
    d_in = max(in_dim, hid)
    d_out = max(hid, out_dim)
    w = jnp.zeros((4, d_in, d_out), jnp.bfloat16)
    w = w.at[0, :in_dim, :hid].set(p["w11"].astype(jnp.bfloat16))
    w = w.at[1, :hid, :hid].set(p["w12"].astype(jnp.bfloat16))
    w = w.at[2, :hid, :hid].set(p["w21"].astype(jnp.bfloat16))
    w = w.at[3, :hid, :out_dim].set(p["w22"].astype(jnp.bfloat16))
    b = jnp.zeros((4, d_out), jnp.float32)
    b = b.at[0, :hid].set(p["b11"].reshape(-1))
    b = b.at[1, :hid].set(p["b12"].reshape(-1))
    b = b.at[2, :hid].set(p["b21"].reshape(-1))
    b = b.at[3, :out_dim].set(p["b22"].reshape(-1))
    return w, b


def pack_head_params(p, out_dim):
    half = out_dim // 2
    w1 = p["w1"]                                           # (2*out_dim, out_dim)
    hw = jnp.zeros((4, out_dim, out_dim), jnp.bfloat16)
    hw = hw.at[0].set(w1[:out_dim].astype(jnp.bfloat16))   # query half of layer 1
    hw = hw.at[1].set(w1[out_dim:].astype(jnp.bfloat16))   # data  half of layer 1
    hw = hw.at[2, :, :half].set(p["w2"].astype(jnp.bfloat16))
    hw = hw.at[3, 0, :half].set(p["w3"][:, 0].astype(jnp.bfloat16))  # as a row
    hb = jnp.zeros((3, out_dim), jnp.float32)
    hb = hb.at[0, :out_dim].set(p["b1"].reshape(-1))
    hb = hb.at[1, :half].set(p["b2"].reshape(-1))
    hb = hb.at[2, 0].set(p["b3"].reshape(-1)[0])
    return hw, hb


def _nbytes(x):
    n = 1
    for d in x.shape:
        n *= d
    return n * jnp.dtype(x.dtype).itemsize


# ---------------------------------------------------------------------------
# Wrapper: one pallas_call over a batch of (query, data) graph pairs
# ---------------------------------------------------------------------------
def basic_count_net_forward(query_feat, data_feat, query_adj_hat, data_adj_hat,
                            query_gin_params, data_gin_params, head_params,
                            pairs_per_block=8):
    """query_feat: (B, Nq, F)  data_feat: (B, Nd, F)
       query_adj_hat: (B, Nq, Nq) = A_q + I   data_adj_hat: (B, Nd, Nd) = A_d + I
       Returns (B, 1) predictions (one module forward per pair)."""
    B, Nq, F = query_feat.shape
    _, Nd, _ = data_feat.shape
    q_hid = query_gin_params["w11"].shape[1]
    d_hid = data_gin_params["w11"].shape[1]
    out_dim = head_params["w2"].shape[0]
    half = out_dim // 2

    pb = pairs_per_block
    assert B % pb == 0, "batch must be a multiple of pairs_per_block"

    # bf16 storage, f32 accumulation inside the kernel.
    q_adj = query_adj_hat.astype(jnp.bfloat16)
    q_x = query_feat.astype(jnp.bfloat16)
    d_adj = data_adj_hat.astype(jnp.bfloat16)
    d_x = data_feat.astype(jnp.bfloat16)

    qw, qb = pack_gin_params(query_gin_params, F, q_hid, out_dim)
    dw, db = pack_gin_params(data_gin_params, F, d_hid, out_dim)
    hw, hb = pack_head_params(head_params, out_dim)

    args = (q_adj, q_x, d_adj, d_x, qw, qb, dw, db, hw, hb)

    in_specs = [
        pl.BlockSpec((pb, Nq, Nq), lambda i: (i, 0, 0)),
        pl.BlockSpec((pb, Nq, F), lambda i: (i, 0, 0)),
        pl.BlockSpec((pb, Nd, Nd), lambda i: (i, 0, 0)),
        pl.BlockSpec((pb, Nd, F), lambda i: (i, 0, 0)),
        # Parameter slabs: constant index_map -> DMA'd once, VMEM-resident.
        pl.BlockSpec(qw.shape, lambda i: (0, 0, 0)),
        pl.BlockSpec(qb.shape, lambda i: (0, 0)),
        pl.BlockSpec(dw.shape, lambda i: (0, 0, 0)),
        pl.BlockSpec(db.shape, lambda i: (0, 0)),
        pl.BlockSpec(hw.shape, lambda i: (0, 0, 0)),
        pl.BlockSpec(hb.shape, lambda i: (0, 0)),
    ]
    out_specs = pl.BlockSpec((pb, 128), lambda i: (i, 0))
    out_shape = jax.ShapeDtypeStruct((B, 128), jnp.float32)

    # Advisory cost estimate (9 matmuls per pair + head).
    flops = 0
    for n_nodes, hid in ((Nq, q_hid), (Nd, d_hid)):
        flops += 2 * B * (n_nodes * n_nodes * F + n_nodes * F * hid
                          + n_nodes * hid * hid + n_nodes * n_nodes * hid
                          + n_nodes * hid * hid + n_nodes * hid * out_dim)
    flops += 2 * B * (2 * out_dim * out_dim + out_dim * half + half)
    bytes_accessed = sum(_nbytes(a) for a in args) + B * 128 * 4

    kernel = functools.partial(count_net_kernel,
                               q_hid=q_hid, d_hid=d_hid, out_dim=out_dim)

    out = pl.pallas_call(
        kernel,
        out_shape=out_shape,
        grid_spec=pltpu.PrefetchScalarGridSpec(
            num_scalar_prefetch=0,
            grid=(B // pb,),
            in_specs=in_specs,
            out_specs=out_specs,
        ),
        compiler_params=pltpu.CompilerParams(
            dimension_semantics=("parallel",)),
        cost_estimate=pl.CostEstimate(flops=flops, transcendentals=0,
                                      bytes_accessed=bytes_accessed),
    )(*args)
    return out[:, :1]


# ---------------------------------------------------------------------------
# Deterministic parameter / input construction
# ---------------------------------------------------------------------------
def make_linear(key, in_dim, out_dim, scale=0.1):
    kw, kb = jax.random.split(key)
    w = jax.random.normal(kw, (in_dim, out_dim), jnp.float32) * scale
    b = jax.random.normal(kb, (1, out_dim), jnp.float32) * scale
    return w, b


def make_gin_params(key, in_dim, hidden_dim, out_dim):
    k = jax.random.split(key, 4)
    w11, b11 = make_linear(k[0], in_dim, hidden_dim)
    w12, b12 = make_linear(k[1], hidden_dim, hidden_dim)
    w21, b21 = make_linear(k[2], hidden_dim, hidden_dim)
    w22, b22 = make_linear(k[3], hidden_dim, out_dim)
    return dict(w11=w11, b11=b11, w12=w12, b12=b12,
                w21=w21, b21=b21, w22=w22, b22=b22)


def make_head_params(key, out_dim):
    k = jax.random.split(key, 3)
    w1, b1 = make_linear(k[0], 2 * out_dim, out_dim)
    w2, b2 = make_linear(k[1], out_dim, out_dim // 2)
    w3, b3 = make_linear(k[2], out_dim // 2, 1)
    return dict(w1=w1, b1=b1, w2=w2, b2=b2, w3=w3, b3=b3)


def make_adj_hat_batch(key, batch, num_nodes, num_edges):
    """Random undirected edge lists per graph -> dense (A + I) per graph.

    Duplicate edges accumulate (scatter-add semantics) and the GIN self term
    (eps = 0) is folded in as +I; PyG orientation: adj[dst, src] aggregates
    messages at dst from src (symmetric here since both directions are added).
    """
    ks, kd = jax.random.split(key)
    src = jax.random.randint(ks, (batch, num_edges), 0, num_nodes)
    dst = (src + 1 + jax.random.randint(kd, (batch, num_edges), 0,
                                        num_nodes - 1)) % num_nodes
    adj = jnp.zeros((batch, num_nodes, num_nodes), jnp.float32)
    b_idx = jnp.arange(batch)[:, None]
    adj = adj.at[b_idx, dst, src].add(1.0)
    adj = adj.at[b_idx, src, dst].add(1.0)
    return adj + jnp.eye(num_nodes, dtype=jnp.float32)[None]


if __name__ == "__main__":
    # Small shapes: input_feat_dim=8, query_hidden=16, data_hidden=32, out_dim=16
    input_feat_dim = 8
    query_hidden_dim = 16
    data_hidden_dim = 32
    out_dim = 16
    n_query, n_data = 8, 16
    batch = 16                       # number of (query, data) pairs per launch

    key = jax.random.PRNGKey(0)
    k_qfeat, k_dfeat, k_qadj, k_dadj, k_qgin, k_dgin, k_head = jax.random.split(key, 7)

    query_feat = jax.random.normal(k_qfeat, (batch, n_query, input_feat_dim), jnp.float32)
    data_feat = jax.random.normal(k_dfeat, (batch, n_data, input_feat_dim), jnp.float32)

    query_adj_hat = make_adj_hat_batch(k_qadj, batch, n_query, 12)
    data_adj_hat = make_adj_hat_batch(k_dadj, batch, n_data, 24)

    # share_net=False -> separate GINs with different hidden dims
    query_gin_params = make_gin_params(k_qgin, input_feat_dim, query_hidden_dim, out_dim)
    data_gin_params = make_gin_params(k_dgin, input_feat_dim, data_hidden_dim, out_dim)
    head_params = make_head_params(k_head, out_dim)

    fwd = jax.jit(basic_count_net_forward)
    pred = fwd(query_feat, data_feat, query_adj_hat, data_adj_hat,
               query_gin_params, data_gin_params, head_params)
    pred = jax.block_until_ready(pred)

    assert pred.shape == (batch, 1) and pred.dtype == jnp.float32
    assert bool(jnp.isfinite(pred).all())
    assert bool((pred >= 0.0).all())          # final nn.ReLU() in the head
    print("KERNEL_OK")
</pallas_src>

<mosaic_0001>
module attributes {stable_mosaic.version = 11 : i64} {
  func.func @count_net_kernel(%arg0: i32, %arg1: memref<8x8x8xbf16, #tpu.memory_space<vmem>>, %arg2: memref<8x8x8xbf16, #tpu.memory_space<vmem>>, %arg3: memref<8x16x16xbf16, #tpu.memory_space<vmem>>, %arg4: memref<8x16x8xbf16, #tpu.memory_space<vmem>>, %arg5: memref<4x16x16xbf16, #tpu.memory_space<vmem>>, %arg6: memref<4x16xf32, #tpu.memory_space<vmem>>, %arg7: memref<4x32x32xbf16, #tpu.memory_space<vmem>>, %arg8: memref<4x32xf32, #tpu.memory_space<vmem>>, %arg9: memref<4x16x16xbf16, #tpu.memory_space<vmem>>, %arg10: memref<3x16xf32, #tpu.memory_space<vmem>>, %arg11: memref<8x128xf32, #tpu.memory_space<vmem>>) attributes {dimension_semantics = [#tpu.dimension_semantics<parallel>], iteration_bounds = array<i64: 2>, scalar_prefetch = 0 : i64, scratch_operands = 0 : i64, tpu.core_type = #tpu.core_type<tc>, window_params = [{transform_indices = @transform_0, window_bounds = array<i64: 8, 8, 8>}, {transform_indices = @transform_1, window_bounds = array<i64: 8, 8, 8>}, {transform_indices = @transform_2, window_bounds = array<i64: 8, 16, 16>}, {transform_indices = @transform_3, window_bounds = array<i64: 8, 16, 8>}, {pipeline_mode = #tpu.pipeline_mode<synchronous>, transform_indices = @transform_4, window_bounds = array<i64: 4, 16, 16>}, {pipeline_mode = #tpu.pipeline_mode<synchronous>, transform_indices = @transform_5, window_bounds = array<i64: 4, 16>}, {pipeline_mode = #tpu.pipeline_mode<synchronous>, transform_indices = @transform_6, window_bounds = array<i64: 4, 32, 32>}, {pipeline_mode = #tpu.pipeline_mode<synchronous>, transform_indices = @transform_7, window_bounds = array<i64: 4, 32>}, {pipeline_mode = #tpu.pipeline_mode<synchronous>, transform_indices = @transform_8, window_bounds = array<i64: 4, 16, 16>}, {pipeline_mode = #tpu.pipeline_mode<synchronous>, transform_indices = @transform_9, window_bounds = array<i64: 3, 16>}, {transform_indices = @transform_10, window_bounds = array<i64: 8, 128>}]} {
    %c0 = arith.constant 0 : index
    %c0_0 = arith.constant 0 : index
    %c0_1 = arith.constant 0 : index
    %0 = vector.load %arg1[%c0, %c0_0, %c0_1] : memref<8x8x8xbf16, #tpu.memory_space<vmem>>, vector<8x8x8xbf16>
    %c0_2 = arith.constant 0 : index
    %c0_3 = arith.constant 0 : index
    %c0_4 = arith.constant 0 : index
    %1 = vector.load %arg2[%c0_2, %c0_3, %c0_4] : memref<8x8x8xbf16, #tpu.memory_space<vmem>>, vector<8x8x8xbf16>
    "tpu.trace_start"() <{level = 10 : i32, message = "bnm,bmf->bnf"}> : () -> ()
    %cst = arith.constant dense<0.000000e+00> : vector<8x8x8xf32>
    %2 = tpu.matmul %0, %1, %cst {dimension_numbers = #tpu.dot_dimension_numbers<[2], [1], [1], [2], [0, 0, 0, 1, 1, 2], [0], [0]>} : vector<8x8x8xbf16>, vector<8x8x8xbf16>, vector<8x8x8xf32> -> vector<8x8x8xf32>
    "tpu.trace_stop"() : () -> ()
    %3 = vector.shape_cast %2 : vector<8x8x8xf32> to vector<64x8xf32>
    %4 = arith.truncf %3 : vector<64x8xf32> to vector<64x8xbf16>
    %c0_5 = arith.constant 0 : index
    %c0_6 = arith.constant 0 : index
    %c0_7 = arith.constant 0 : index
    %5 = vector.load %arg5[%c0_5, %c0_6, %c0_7] : memref<4x16x16xbf16, #tpu.memory_space<vmem>>, vector<1x8x16xbf16>
    %6 = vector.shape_cast %5 : vector<1x8x16xbf16> to vector<8x16xbf16>
    %cst_8 = arith.constant dense<0.000000e+00> : vector<64x16xf32>
    %7 = tpu.matmul %4, %6, %cst_8 {dimension_numbers = #tpu.dot_dimension_numbers<[1], [0], [0], [1], [0, 0, 1, 1], [], []>} : vector<64x8xbf16>, vector<8x16xbf16>, vector<64x16xf32> -> vector<64x16xf32>
    %c0_9 = arith.constant 0 : index
    %c0_10 = arith.constant 0 : index
    %8 = vector.load %arg6[%c0_9, %c0_10] : memref<4x16xf32, #tpu.memory_space<vmem>>, vector<1x16xf32>
    %9 = vector.broadcast %8 : vector<1x16xf32> to vector<64x16xf32>
    %10 = arith.addf %7, %9 : vector<64x16xf32>
    %cst_11 = arith.constant 0.000000e+00 : f32
    %11 = vector.broadcast %cst_11 : f32 to vector<64x16xf32>
    %12 = arith.maximumf %10, %11 : vector<64x16xf32>
    %13 = arith.truncf %12 : vector<64x16xf32> to vector<64x16xbf16>
    %c1 = arith.constant 1 : index
    %c0_12 = arith.constant 0 : index
    %c0_13 = arith.constant 0 : index
    %14 = vector.load %arg5[%c1, %c0_12, %c0_13] : memref<4x16x16xbf16, #tpu.memory_space<vmem>>, vector<1x16x16xbf16>
    %15 = vector.shape_cast %14 : vector<1x16x16xbf16> to vector<16x16xbf16>
    %cst_14 = arith.constant dense<0.000000e+00> : vector<64x16xf32>
    %16 = tpu.matmul %13, %15, %cst_14 {dimension_numbers = #tpu.dot_dimension_numbers<[1], [0], [0], [1], [0, 0, 1, 1], [], []>} : vector<64x16xbf16>, vector<16x16xbf16>, vector<64x16xf32> -> vector<64x16xf32>
    %c1_15 = arith.constant 1 : index
    %c0_16 = arith.constant 0 : index
    %17 = vector.load %arg6[%c1_15, %c0_16] : memref<4x16xf32, #tpu.memory_space<vmem>>, vector<1x16xf32>
    %18 = vector.broadcast %17 : vector<1x16xf32> to vector<64x16xf32>
    %19 = arith.addf %16, %18 : vector<64x16xf32>
    %cst_17 = arith.constant 0.000000e+00 : f32
    %20 = vector.broadcast %cst_17 : f32 to vector<64x16xf32>
    %21 = arith.maximumf %19, %20 : vector<64x16xf32>
    %22 = vector.shape_cast %21 : vector<64x16xf32> to vector<8x8x16xf32>
    %23 = arith.truncf %22 : vector<8x8x16xf32> to vector<8x8x16xbf16>
    "tpu.trace_start"() <{level = 10 : i32, message = "bnm,bmf->bnf"}> : () -> ()
    %cst_18 = arith.constant dense<0.000000e+00> : vector<8x8x16xf32>
    %24 = tpu.matmul %0, %23, %cst_18 {dimension_numbers = #tpu.dot_dimension_numbers<[2], [1], [1], [2], [0, 0, 0, 1, 1, 2], [0], [0]>} : vector<8x8x8xbf16>, vector<8x8x16xbf16>, vector<8x8x16xf32> -> vector<8x8x16xf32>
    "tpu.trace_stop"() : () -> ()
    %25 = vector.shape_cast %24 : vector<8x8x16xf32> to vector<64x16xf32>
    %26 = arith.truncf %25 : vector<64x16xf32> to vector<64x16xbf16>
    %c2 = arith.constant 2 : index
    %c0_19 = arith.constant 0 : index
    %c0_20 = arith.constant 0 : index
    %27 = vector.load %arg5[%c2, %c0_19, %c0_20] : memref<4x16x16xbf16, #tpu.memory_space<vmem>>, vector<1x16x16xbf16>
    %28 = vector.shape_cast %27 : vector<1x16x16xbf16> to vector<16x16xbf16>
    %cst_21 = arith.constant dense<0.000000e+00> : vector<64x16xf32>
    %29 = tpu.matmul %26, %28, %cst_21 {dimension_numbers = #tpu.dot_dimension_numbers<[1], [0], [0], [1], [0, 0, 1, 1], [], []>} : vector<64x16xbf16>, vector<16x16xbf16>, vector<64x16xf32> -> vector<64x16xf32>
    %c2_22 = arith.constant 2 : index
    %c0_23 = arith.constant 0 : index
    %30 = vector.load %arg6[%c2_22, %c0_23] : memref<4x16xf32, #tpu.memory_space<vmem>>, vector<1x16xf32>
    %31 = vector.broadcast %30 : vector<1x16xf32> to vector<64x16xf32>
    %32 = arith.addf %29, %31 : vector<64x16xf32>
    %cst_24 = arith.constant 0.000000e+00 : f32
    %33 = vector.broadcast %cst_24 : f32 to vector<64x16xf32>
    %34 = arith.maximumf %32, %33 : vector<64x16xf32>
    %35 = arith.truncf %34 : vector<64x16xf32> to vector<64x16xbf16>
    %c3 = arith.constant 3 : index
    %c0_25 = arith.constant 0 : index
    %c0_26 = arith.constant 0 : index
    %36 = vector.load %arg5[%c3, %c0_25, %c0_26] : memref<4x16x16xbf16, #tpu.memory_space<vmem>>, vector<1x16x16xbf16>
    %37 = vector.shape_cast %36 : vector<1x16x16xbf16> to vector<16x16xbf16>
    %cst_27 = arith.constant dense<0.000000e+00> : vector<64x16xf32>
    %38 = tpu.matmul %35, %37, %cst_27 {dimension_numbers = #tpu.dot_dimension_numbers<[1], [0], [0], [1], [0, 0, 1, 1], [], []>} : vector<64x16xbf16>, vector<16x16xbf16>, vector<64x16xf32> -> vector<64x16xf32>
    %c3_28 = arith.constant 3 : index
    %c0_29 = arith.constant 0 : index
    %39 = vector.load %arg6[%c3_28, %c0_29] : memref<4x16xf32, #tpu.memory_space<vmem>>, vector<1x16xf32>
    %40 = vector.broadcast %39 : vector<1x16xf32> to vector<64x16xf32>
    %41 = arith.addf %38, %40 : vector<64x16xf32>
    %cst_30 = arith.constant 0.000000e+00 : f32
    %42 = vector.broadcast %cst_30 : f32 to vector<64x16xf32>
    %43 = arith.maximumf %41, %42 : vector<64x16xf32>
    %44 = vector.shape_cast %43 : vector<64x16xf32> to vector<8x8x16xf32>
    %cst_31 = arith.constant dense<0.000000e+00> : vector<8x16xf32>
    %45 = vector.multi_reduction <add>, %44, %cst_31 [1] : vector<8x8x16xf32> to vector<8x16xf32>
    %c0_32 = arith.constant 0 : index
    %c0_33 = arith.constant 0 : index
    %c0_34 = arith.constant 0 : index
    %46 = vector.load %arg3[%c0_32, %c0_33, %c0_34] : memref<8x16x16xbf16, #tpu.memory_space<vmem>>, vector<8x16x16xbf16>
    %c0_35 = arith.constant 0 : index
    %c0_36 = arith.constant 0 : index
    %c0_37 = arith.constant 0 : index
    %47 = vector.load %arg4[%c0_35, %c0_36, %c0_37] : memref<8x16x8xbf16, #tpu.memory_space<vmem>>, vector<8x16x8xbf16>
    "tpu.trace_start"() <{level = 10 : i32, message = "bnm,bmf->bnf"}> : () -> ()
    %cst_38 = arith.constant dense<0.000000e+00> : vector<8x16x8xf32>
    %48 = tpu.matmul %46, %47, %cst_38 {dimension_numbers = #tpu.dot_dimension_numbers<[2], [1], [1], [2], [0, 0, 0, 1, 1, 2], [0], [0]>} : vector<8x16x16xbf16>, vector<8x16x8xbf16>, vector<8x16x8xf32> -> vector<8x16x8xf32>
    "tpu.trace_stop"() : () -> ()
    %49 = vector.shape_cast %48 : vector<8x16x8xf32> to vector<128x8xf32>
    %50 = arith.truncf %49 : vector<128x8xf32> to vector<128x8xbf16>
    %c0_39 = arith.constant 0 : index
    %c0_40 = arith.constant 0 : index
    %c0_41 = arith.constant 0 : index
    %51 = vector.load %arg7[%c0_39, %c0_40, %c0_41] : memref<4x32x32xbf16, #tpu.memory_space<vmem>>, vector<1x8x32xbf16>
    %52 = vector.shape_cast %51 : vector<1x8x32xbf16> to vector<8x32xbf16>
    %cst_42 = arith.constant dense<0.000000e+00> : vector<128x32xf32>
    %53 = tpu.matmul %50, %52, %cst_42 {dimension_numbers = #tpu.dot_dimension_numbers<[1], [0], [0], [1], [0, 0, 1, 1], [], []>} : vector<128x8xbf16>, vector<8x32xbf16>, vector<128x32xf32> -> vector<128x32xf32>
    %c0_43 = arith.constant 0 : index
    %c0_44 = arith.constant 0 : index
    %54 = vector.load %arg8[%c0_43, %c0_44] : memref<4x32xf32, #tpu.memory_space<vmem>>, vector<1x32xf32>
    %55 = vector.broadcast %54 : vector<1x32xf32> to vector<128x32xf32>
    %56 = arith.addf %53, %55 : vector<128x32xf32>
    %cst_45 = arith.constant 0.000000e+00 : f32
    %57 = vector.broadcast %cst_45 : f32 to vector<128x32xf32>
    %58 = arith.maximumf %56, %57 : vector<128x32xf32>
    %59 = arith.truncf %58 : vector<128x32xf32> to vector<128x32xbf16>
    %c1_46 = arith.constant 1 : index
    %c0_47 = arith.constant 0 : index
    %c0_48 = arith.constant 0 : index
    %60 = vector.load %arg7[%c1_46, %c0_47, %c0_48] : memref<4x32x32xbf16, #tpu.memory_space<vmem>>, vector<1x32x32xbf16>
    %61 = vector.shape_cast %60 : vector<1x32x32xbf16> to vector<32x32xbf16>
    %cst_49 = arith.constant dense<0.000000e+00> : vector<128x32xf32>
    %62 = tpu.matmul %59, %61, %cst_49 {dimension_numbers = #tpu.dot_dimension_numbers<[1], [0], [0], [1], [0, 0, 1, 1], [], []>} : vector<128x32xbf16>, vector<32x32xbf16>, vector<128x32xf32> -> vector<128x32xf32>
    %c1_50 = arith.constant 1 : index
    %c0_51 = arith.constant 0 : index
    %63 = vector.load %arg8[%c1_50, %c0_51] : memref<4x32xf32, #tpu.memory_space<vmem>>, vector<1x32xf32>
    %64 = vector.broadcast %63 : vector<1x32xf32> to vector<128x32xf32>
    %65 = arith.addf %62, %64 : vector<128x32xf32>
    %cst_52 = arith.constant 0.000000e+00 : f32
    %66 = vector.broadcast %cst_52 : f32 to vector<128x32xf32>
    %67 = arith.maximumf %65, %66 : vector<128x32xf32>
    %68 = vector.shape_cast %67 : vector<128x32xf32> to vector<8x16x32xf32>
    %69 = arith.truncf %68 : vector<8x16x32xf32> to vector<8x16x32xbf16>
    "tpu.trace_start"() <{level = 10 : i32, message = "bnm,bmf->bnf"}> : () -> ()
    %cst_53 = arith.constant dense<0.000000e+00> : vector<8x16x32xf32>
    %70 = tpu.matmul %46, %69, %cst_53 {dimension_numbers = #tpu.dot_dimension_numbers<[2], [1], [1], [2], [0, 0, 0, 1, 1, 2], [0], [0]>} : vector<8x16x16xbf16>, vector<8x16x32xbf16>, vector<8x16x32xf32> -> vector<8x16x32xf32>
    "tpu.trace_stop"() : () -> ()
    %71 = vector.shape_cast %70 : vector<8x16x32xf32> to vector<128x32xf32>
    %72 = arith.truncf %71 : vector<128x32xf32> to vector<128x32xbf16>
    %c2_54 = arith.constant 2 : index
    %c0_55 = arith.constant 0 : index
    %c0_56 = arith.constant 0 : index
    %73 = vector.load %arg7[%c2_54, %c0_55, %c0_56] : memref<4x32x32xbf16, #tpu.memory_space<vmem>>, vector<1x32x32xbf16>
    %74 = vector.shape_cast %73 : vector<1x32x32xbf16> to vector<32x32xbf16>
    %cst_57 = arith.constant dense<0.000000e+00> : vector<128x32xf32>
    %75 = tpu.matmul %72, %74, %cst_57 {dimension_numbers = #tpu.dot_dimension_numbers<[1], [0], [0], [1], [0, 0, 1, 1], [], []>} : vector<128x32xbf16>, vector<32x32xbf16>, vector<128x32xf32> -> vector<128x32xf32>
    %c2_58 = arith.constant 2 : index
    %c0_59 = arith.constant 0 : index
    %76 = vector.load %arg8[%c2_58, %c0_59] : memref<4x32xf32, #tpu.memory_space<vmem>>, vector<1x32xf32>
    %77 = vector.broadcast %76 : vector<1x32xf32> to vector<128x32xf32>
    %78 = arith.addf %75, %77 : vector<128x32xf32>
    %cst_60 = arith.constant 0.000000e+00 : f32
    %79 = vector.broadcast %cst_60 : f32 to vector<128x32xf32>
    %80 = arith.maximumf %78, %79 : vector<128x32xf32>
    %81 = arith.truncf %80 : vector<128x32xf32> to vector<128x32xbf16>
    %c3_61 = arith.constant 3 : index
    %c0_62 = arith.constant 0 : index
    %c0_63 = arith.constant 0 : index
    %82 = vector.load %arg7[%c3_61, %c0_62, %c0_63] : memref<4x32x32xbf16, #tpu.memory_space<vmem>>, vector<1x32x16xbf16>
    %83 = vector.shape_cast %82 : vector<1x32x16xbf16> to vector<32x16xbf16>
    %cst_64 = arith.constant dense<0.000000e+00> : vector<128x16xf32>
    %84 = tpu.matmul %81, %83, %cst_64 {dimension_numbers = #tpu.dot_dimension_numbers<[1], [0], [0], [1], [0, 0, 1, 1], [], []>} : vector<128x32xbf16>, vector<32x16xbf16>, vector<128x16xf32> -> vector<128x16xf32>
    %c3_65 = arith.constant 3 : index
    %c0_66 = arith.constant 0 : index
    %85 = vector.load %arg8[%c3_65, %c0_66] : memref<4x32xf32, #tpu.memory_space<vmem>>, vector<1x16xf32>
    %86 = vector.broadcast %85 : vector<1x16xf32> to vector<128x16xf32>
    %87 = arith.addf %84, %86 : vector<128x16xf32>
    %cst_67 = arith.constant 0.000000e+00 : f32
    %88 = vector.broadcast %cst_67 : f32 to vector<128x16xf32>
    %89 = arith.maximumf %87, %88 : vector<128x16xf32>
    %90 = vector.shape_cast %89 : vector<128x16xf32> to vector<8x16x16xf32>
    %cst_68 = arith.constant dense<0.000000e+00> : vector<8x16xf32>
    %91 = vector.multi_reduction <add>, %90, %cst_68 [1] : vector<8x16x16xf32> to vector<8x16xf32>
    %92 = arith.truncf %45 : vector<8x16xf32> to vector<8x16xbf16>
    %c0_69 = arith.constant 0 : index
    %c0_70 = arith.constant 0 : index
    %c0_71 = arith.constant 0 : index
    %93 = vector.load %arg9[%c0_69, %c0_70, %c0_71] : memref<4x16x16xbf16, #tpu.memory_space<vmem>>, vector<1x16x16xbf16>
    %94 = vector.shape_cast %93 : vector<1x16x16xbf16> to vector<16x16xbf16>
    %cst_72 = arith.constant dense<0.000000e+00> : vector<8x16xf32>
    %95 = tpu.matmul %92, %94, %cst_72 {dimension_numbers = #tpu.dot_dimension_numbers<[1], [0], [0], [1], [0, 0, 1, 1], [], []>} : vector<8x16xbf16>, vector<16x16xbf16>, vector<8x16xf32> -> vector<8x16xf32>
    %96 = arith.truncf %91 : vector<8x16xf32> to vector<8x16xbf16>
    %c1_73 = arith.constant 1 : index
    %c0_74 = arith.constant 0 : index
    %c0_75 = arith.constant 0 : index
    %97 = vector.load %arg9[%c1_73, %c0_74, %c0_75] : memref<4x16x16xbf16, #tpu.memory_space<vmem>>, vector<1x16x16xbf16>
    %98 = vector.shape_cast %97 : vector<1x16x16xbf16> to vector<16x16xbf16>
    %cst_76 = arith.constant dense<0.000000e+00> : vector<8x16xf32>
    %99 = tpu.matmul %96, %98, %cst_76 {dimension_numbers = #tpu.dot_dimension_numbers<[1], [0], [0], [1], [0, 0, 1, 1], [], []>} : vector<8x16xbf16>, vector<16x16xbf16>, vector<8x16xf32> -> vector<8x16xf32>
    %100 = arith.addf %95, %99 : vector<8x16xf32>
    %c0_77 = arith.constant 0 : index
    %c0_78 = arith.constant 0 : index
    %101 = vector.load %arg10[%c0_77, %c0_78] : memref<3x16xf32, #tpu.memory_space<vmem>>, vector<1x16xf32>
    %102 = vector.broadcast %101 : vector<1x16xf32> to vector<8x16xf32>
    %103 = arith.addf %100, %102 : vector<8x16xf32>
    %cst_79 = arith.constant 0.000000e+00 : f32
    %104 = vector.broadcast %cst_79 : f32 to vector<8x16xf32>
    %105 = arith.maximumf %103, %104 : vector<8x16xf32>
    %106 = arith.truncf %105 : vector<8x16xf32> to vector<8x16xbf16>
    %c2_80 = arith.constant 2 : index
    %c0_81 = arith.constant 0 : index
    %c0_82 = arith.constant 0 : index
    %107 = vector.load %arg9[%c2_80, %c0_81, %c0_82] : memref<4x16x16xbf16, #tpu.memory_space<vmem>>, vector<1x16x8xbf16>
    %108 = vector.shape_cast %107 : vector<1x16x8xbf16> to vector<16x8xbf16>
    %cst_83 = arith.constant dense<0.000000e+00> : vector<8x8xf32>
    %109 = tpu.matmul %106, %108, %cst_83 {dimension_numbers = #tpu.dot_dimension_numbers<[1], [0], [0], [1], [0, 0, 1, 1], [], []>} : vector<8x16xbf16>, vector<16x8xbf16>, vector<8x8xf32> -> vector<8x8xf32>
    %c1_84 = arith.constant 1 : index
    %c0_85 = arith.constant 0 : index
    %110 = vector.load %arg10[%c1_84, %c0_85] : memref<3x16xf32, #tpu.memory_space<vmem>>, vector<1x8xf32>
    %111 = vector.broadcast %110 : vector<1x8xf32> to vector<8x8xf32>
    %112 = arith.addf %109, %111 : vector<8x8xf32>
    %cst_86 = arith.constant 0.000000e+00 : f32
    %113 = vector.broadcast %cst_86 : f32 to vector<8x8xf32>
    %114 = arith.maximumf %112, %113 : vector<8x8xf32>
    %c3_87 = arith.constant 3 : index
    %c0_88 = arith.constant 0 : index
    %c0_89 = arith.constant 0 : index
    %115 = vector.load %arg9[%c3_87, %c0_88, %c0_89] : memref<4x16x16xbf16, #tpu.memory_space<vmem>>, vector<1x1x8xbf16>
    %116 = vector.shape_cast %115 : vector<1x1x8xbf16> to vector<1x8xbf16>
    %117 = arith.extf %116 : vector<1x8xbf16> to vector<1x8xf32>
    %118 = vector.broadcast %117 : vector<1x8xf32> to vector<8x8xf32>
    %119 = arith.mulf %114, %118 : vector<8x8xf32>
    %cst_90 = arith.constant dense<0.000000e+00> : vector<8xf32>
    %120 = vector.multi_reduction <add>, %119, %cst_90 [1] : vector<8x8xf32> to vector<8xf32>
    %121 = vector.shape_cast %120 : vector<8xf32> to vector<8x1xf32>
    %c2_91 = arith.constant 2 : index
    %c0_92 = arith.constant 0 : index
    %122 = vector.load %arg10[%c2_91, %c0_92] : memref<3x16xf32, #tpu.memory_space<vmem>>, vector<1x1xf32>
    %123 = vector.broadcast %122 : vector<1x1xf32> to vector<8x1xf32>
    %124 = arith.addf %121, %123 : vector<8x1xf32>
    %cst_93 = arith.constant 0.000000e+00 : f32
    %125 = vector.broadcast %cst_93 : f32 to vector<8x1xf32>
    %126 = arith.maximumf %124, %125 : vector<8x1xf32>
    %127 = vector.shape_cast %126 : vector<8x1xf32> to vector<8x1xf32>
    %128 = vector.broadcast %127 : vector<8x1xf32> to vector<8x128xf32>
    %c0_94 = arith.constant 0 : index
    %c0_95 = arith.constant 0 : index
    %129 = vector.load %arg11[%c0_94, %c0_95] : memref<8x128xf32, #tpu.memory_space<vmem>>, vector<8x128xf32>
    tpu.vector_store %arg11[%c0_94, %c0_95], %128 {strides = array<i32>} : memref<8x128xf32, #tpu.memory_space<vmem>>, vector<8x128xf32>,
    return
  }
  func.func @transform_0(%arg0: i32) -> (i32, i32, i32) {
    %c0_i32 = arith.constant 0 : i32
    %c0_i32_0 = arith.constant 0 : i32
    %c0_i32_1 = arith.constant 0 : i32
    return %arg0, %c0_i32, %c0_i32_0 : i32, i32, i32
  }
  func.func @transform_1(%arg0: i32) -> (i32, i32, i32) {
    %c0_i32 = arith.constant 0 : i32
    %c0_i32_0 = arith.constant 0 : i32
    %c0_i32_1 = arith.constant 0 : i32
    return %arg0, %c0_i32, %c0_i32_0 : i32, i32, i32
  }
  func.func @transform_2(%arg0: i32) -> (i32, i32, i32) {
    %c0_i32 = arith.constant 0 : i32
    %c0_i32_0 = arith.constant 0 : i32
    %c0_i32_1 = arith.constant 0 : i32
    return %arg0, %c0_i32, %c0_i32_0 : i32, i32, i32
  }
  func.func @transform_3(%arg0: i32) -> (i32, i32, i32) {
    %c0_i32 = arith.constant 0 : i32
    %c0_i32_0 = arith.constant 0 : i32
    %c0_i32_1 = arith.constant 0 : i32
    return %arg0, %c0_i32, %c0_i32_0 : i32, i32, i32
  }
  func.func @transform_4(%arg0: i32) -> (i32, i32, i32) {
    %c0_i32 = arith.constant 0 : i32
    %c0_i32_0 = arith.constant 0 : i32
    %c0_i32_1 = arith.constant 0 : i32
    %c0_i32_2 = arith.constant 0 : i32
    return %c0_i32, %c0_i32_0, %c0_i32_1 : i32, i32, i32
  }
  func.func @transform_5(%arg0: i32) -> (i32, i32) {
    %c0_i32 = arith.constant 0 : i32
    %c0_i32_0 = arith.constant 0 : i32
    %c0_i32_1 = arith.constant 0 : i32
    return %c0_i32, %c0_i32_0 : i32, i32
  }
  func.func @transform_6(%arg0: i32) -> (i32, i32, i32) {
    %c0_i32 = arith.constant 0 : i32
    %c0_i32_0 = arith.constant 0 : i32
    %c0_i32_1 = arith.constant 0 : i32
    %c0_i32_2 = arith.constant 0 : i32
    return %c0_i32, %c0_i32_0, %c0_i32_1 : i32, i32, i32
  }
  func.func @transform_7(%arg0: i32) -> (i32, i32) {
    %c0_i32 = arith.constant 0 : i32
    %c0_i32_0 = arith.constant 0 : i32
    %c0_i32_1 = arith.constant 0 : i32
    return %c0_i32, %c0_i32_0 : i32, i32
  }
  func.func @transform_8(%arg0: i32) -> (i32, i32, i32) {
    %c0_i32 = arith.constant 0 : i32
    %c0_i32_0 = arith.constant 0 : i32
    %c0_i32_1 = arith.constant 0 : i32
    %c0_i32_2 = arith.constant 0 : i32
    return %c0_i32, %c0_i32_0, %c0_i32_1 : i32, i32, i32
  }
  func.func @transform_9(%arg0: i32) -> (i32, i32) {
    %c0_i32 = arith.constant 0 : i32
    %c0_i32_0 = arith.constant 0 : i32
    %c0_i32_1 = arith.constant 0 : i32
    return %c0_i32, %c0_i32_0 : i32, i32
  }
  func.func @transform_10(%arg0: i32) -> (i32, i32) {
    %c0_i32 = arith.constant 0 : i32
    %c0_i32_0 = arith.constant 0 : i32
    return %arg0, %c0_i32 : i32, i32
  }
}

</mosaic_0001>

<bundles_post_ra>
// kernel: basic_count_net_forward.1
= control target key start
LH: loop header
LB: loop body
LE: loop exit
PB: predicated region body
PF: predicated region fallthrough
CT: control target
= control target key end

     0   :  { %s4254_s13 = smov 0   ;;  %s4775_s0 = inlined_call_operand.vmem [shape: bf16[16,8,8], index: 0, kind: input, shape index: {}]   ;;  %s4776_s1 = inlined_call_operand.vmem [shape: bf16[16,8,8], index: 1, kind: input, shape index: {}]   ;;  %s4777_s2 = inlined_call_operand.vmem [shape: bf16[16,16,16], index: 2, kind: input, shape index: {}]   ;;  %s4778_s3 = inlined_call_operand.vmem [shape: bf16[16,16,8], index: 3, kind: input, shape index: {}]   ;;  %s4779_s4 = inlined_call_operand.vmem [shape: bf16[4,16,16], index: 4, kind: input, shape index: {}]   ;;  %s4780_s5 = inlined_call_operand.vmem [shape: f32[4,16], index: 5, kind: input, shape index: {}]   ;;  %s4781_s6 = inlined_call_operand.vmem [shape: bf16[4,32,32], index: 6, kind: input, shape index: {}]   ;;  %s4782_s7 = inlined_call_operand.vmem [shape: f32[4,32], index: 7, kind: input, shape index: {}]   ;;  %s4783_s8 = inlined_call_operand.vmem [shape: bf16[4,16,16], index: 8, kind: input, shape index: {}]   ;;  %s4784_s9 = inlined_call_operand.vmem [shape: f32[3,16], index: 9, kind: input, shape index: {}]   ;;  %s4785_s10 = inlined_call_operand.vmem [shape: f32[16,128], index: 10, kind: output, shape index: {}]  }
   0x1 LB: > { %s4260_s14 = sadd.s32 4294967295, %s4194_s13   ;;  %p3528_p0 = scmp.ge.s32.totalorder %s4194_s13, 1  ;;  %s4194_s13 = sphi %s4254_s13, %s20_s13  }
   0x2   : > { %p348_p1 = scmp.lt.s32.totalorder %s4194_s13, 3 }
   0x4   : > { %p349_p2 = pnand %p3528_p0, %p348_p1 }
   0x5   : > { %s3529_s15 = sshll.u32 (!%p349_p2), %s4260_s14, 3  ;;  %v4196_v0 = vmov (!%p349_p2), 0.0   ;;  %vm4197_vm0 = vmmov (!%p349_p2), 0   ;;  %vm453_vm1 = vcmask (!%p349_p2), 1043456   ;;  %vm449_vm2 = vcmask (!%p349_p2), 64512   ;;  %v4160_v63 = vld [vmem:[%s4779_s4 + $0x8] sm:$0xff] (!%p349_p2)  }
   0x6   : > { %352 = sbr.rel (%p349_p2) target bundleno = 3240 (0xca8), region = 60  ;;  %3818 = vmatprep.subr.bf16.mxu0 (!%p349_p2), %v4196_v0  ;;  %3824 = vmatprep.subr.bf16.mxu1 (!%p349_p2), %v4196_v0  ;;  %p403_p3 = scmp.lt.s32.totalorder (!%p349_p2), %s3529_s15, 15  ;;  %v823_v25 = vld [vmem:[%s4779_s4] sm:$0xf] (!%p349_p2)  ;;  %vm935_vm3 = vcmask (!%p349_p2), 130048   ;;  %vm3208_vm4 = vcmask (!%p349_p2), 1041409  }
   0x7   : > { %3820 = vmatprep.mubr.msk.bf16.mxu0 (!%p349_p2), %vm4197_vm0, %v4196_v0  ;;  %3826 = vmatprep.mubr.msk.bf16.mxu1 (!%p349_p2), %vm4197_vm0, %v4196_v0  ;;  %v842_v26 = vsel (!%p349_p2), %vm453_vm1, %v823_v25, 0  ;;  %vm3210_vm5 = vcmask (!%p349_p2), 1042434   ;;  %vm3212_vm6 = vcmask (!%p349_p2), 1043459   ;;  %vm3214_vm7 = vcmask (!%p349_p2), 1044484   ;;  %p428_p4 = scmp.lt.s32.totalorder (!%p349_p2), %s4260_s14, 1 }
   0x8   : > { %vm3216_vm8 = vcmask (!%p349_p2), 1045509   ;;  %vm3218_vm9 = vcmask (!%p349_p2), 1046534   ;;  %vm3220_vm10 = vcmask (!%p349_p2), 1047559   ;;  %vm2291_vm11 = vcmask (!%p349_p2), 261120  }
   0xd   : > { %s4787_s15 = smov (!%p403_p3, %s3529_s15), 15  ;;  %s4789_s14 = smov (!%p428_p4, %s4260_s14), 1 }
   0xe   : > { %s3530_s16 = sshll.u32 %s4787_s15, 2  ;;  %s3687_s23 = sshll.u32 %s4787_s15, 3 }
   0xf   : > { %s412_s19 = scalar_lea.vmem %s4776_s1, %s3530_s16  ;;  %s4280_s22 = scalar_lea.vmem %s4775_s0, %s3530_s16 }
  0x10   : > { %v441_v1 = vld [vmem:[%s412_s19] sm:$0xf]  ;;  %v442_v2 = vld [vmem:[%s412_s19 + $0x4] sm:$0xf]  ;;  %v443_v3 = vld [vmem:[%s412_s19 + $0x8] sm:$0xf]  ;;  %s4302_s26 = scalar_lea.vmem %s4778_s3, %s3687_s23  ;;  %s4307_s29 = scalar_lea.vmem %s4777_s2, %s3687_s23 }
  0x11   : > { %v455_v4 = vsel %vm453_vm1, %v441_v1, 0  ;;  %v501_v5 = vsel %vm453_vm1, %v442_v2, 0  ;;  %v4285_v6 = vld [vmem:[%s4280_s22] sm:$0xf]  ;;  %v4288_v7 = vld [vmem:[%s4280_s22 + $0x4] sm:$0xf] }
  0x12   : > { %3819 = vmatpush3.bf16.msra.mxu0 %v455_v4  ;;  %3825 = vmatpush3.bf16.msra.mxu1 %v501_v5  ;;  %v444_v8 = vld [vmem:[%s412_s19 + $0xc] sm:$0xf]  ;;  %v547_v9 = vsel %vm453_vm1, %v443_v3, 0  ;;  %v445_v11 = vld [vmem:[%s412_s19 + $0x10] sm:$0xf] }
  0x13   : > { %3830 = vmatprep.subr.bf16.mxu0 %v4196_v0  ;;  %3836 = vmatprep.subr.bf16.mxu1 %v4196_v0  ;;  %v593_v10 = vsel %vm453_vm1, %v444_v8, 0  ;;  %v446_v12 = vld [vmem:[%s412_s19 + $0x14] sm:$0xf]  ;;  %v447_v13 = vld [vmem:[%s412_s19 + $0x18] sm:$0xf]  ;;  %v639_v15 = vsel %vm453_vm1, %v445_v11, 0 }
  0x14   : > { %v448_v14 = vld [vmem:[%s412_s19 + $0x1c] sm:$0xf]  ;;  %v685_v16 = vsel %vm453_vm1, %v446_v12, 0  ;;  %v731_v17 = vsel %vm453_vm1, %v447_v13, 0  ;;  %v4318_v19 = vld [vmem:[%s4280_s22 + $0x8] sm:$0xf] }
  0x15   : > { %3821 = vmatmul.mubr.msk.bf16.vlgmr.msra.gmra.mrb[0].mxu0 %vm449_vm2, %v4285_v6  ;;  %3827 = vmatmul.mubr.msk.bf16.vlgmr.msra.gmra.mrb[0].mxu1 %vm449_vm2, %v4288_v7  ;;  %v777_v18 = vsel %vm453_vm1, %v448_v14, 0  ;;  %v4321_v20 = vld [vmem:[%s4280_s22 + $0xc] sm:$0xf]  ;;  %v4334_v21 = vld [vmem:[%s4280_s22 + $0x10] sm:$0xf] }
  0x16   : > { %3831 = vmatpush3.bf16.msra.mxu0 %v547_v9  ;;  %3837 = vmatpush3.bf16.msra.mxu1 %v593_v10  ;;  %v4337_v22 = vld [vmem:[%s4280_s22 + $0x14] sm:$0xf]  ;;  %v4350_v23 = vld [vmem:[%s4280_s22 + $0x18] sm:$0xf]  ;;  %v4353_v24 = vld [vmem:[%s4280_s22 + $0x1c] sm:$0xf] }
  0x17   : > { %3832 = vmatprep.mubr.msk.bf16.mxu0 %vm4197_vm0, %v4196_v0  ;;  %3838 = vmatprep.mubr.msk.bf16.mxu1 %vm4197_vm0, %v4196_v0  ;;  %v3548_v1 = vld [vmem:[%s4780_s5] ss:$0 sm:$0xff] }
  0x18   : > { %3842 = vmatprep.subr.bf16.mxu0 %v4196_v0  ;;  %3848 = vmatprep.subr.bf16.mxu1 %v4196_v0 }
  0x1d   : > { %3833 = vmatmul.mubr.msk.bf16.vlgmr.msra.gmra.mrb[4].mxu0 %vm449_vm2, %v4318_v19  ;;  %3839 = vmatmul.mubr.msk.bf16.vlgmr.msra.gmra.mrb[4].mxu1 %vm449_vm2, %v4321_v20 }
  0x1e   : > { %3843 = vmatpush3.bf16.msra.mxu0 %v639_v15  ;;  %3849 = vmatpush3.bf16.msra.mxu1 %v685_v16 }
  0x1f   : > { %3844 = vmatprep.mubr.msk.bf16.mxu0 %vm4197_vm0, %v4196_v0  ;;  %3850 = vmatprep.mubr.msk.bf16.mxu1 %vm4197_vm0, %v4196_v0 }
  0x20   : > { %3854 = vmatprep.subr.bf16.mxu0 %v4196_v0  ;;  %3860 = vmatprep.subr.bf16.mxu1 %v4196_v0 }
  0x25   : > { %3845 = vmatmul.mubr.msk.bf16.vlgmr.msra.gmra.mrb[8].mxu0 %vm449_vm2, %v4334_v21  ;;  %3851 = vmatmul.mubr.msk.bf16.vlgmr.msra.gmra.mrb[8].mxu1 %vm449_vm2, %v4337_v22 }
  0x26   : > { %3855 = vmatpush3.bf16.msra.mxu0 %v731_v17  ;;  %3861 = vmatpush3.bf16.msra.mxu1 %v777_v18 }
  0x27   : > { %3856 = vmatprep.mubr.msk.bf16.mxu0 %vm4197_vm0, %v4196_v0  ;;  %3862 = vmatprep.mubr.msk.bf16.mxu1 %vm4197_vm0, %v4196_v0 }
  0x28   : > { %4146 = vmatprep.subr.msk.bf16.mxu0 %vm453_vm1, %v823_v25  ;;  %3876 = vmatprep.subr.bf16.mxu1 %v4160_v63 }
  0x2d   : > { %3857 = vmatmul.mubr.msk.bf16.vlgmr.msra.gmra.mrb[12].mxu0 %vm449_vm2, %v4350_v23  ;;  %3863 = vmatmul.mubr.msk.bf16.vlgmr.msra.gmra.mrb[12].mxu1 %vm449_vm2, %v4353_v24 }
  0x2e   : > { %3867 = vmatpush3.bf16.msra.mxu0 %v842_v26  ;;  %3877 = vmatpush3.bf16.msra.mxu1 %v4160_v63 }
  0x2f   : > { %3886 = vmatprep.subr.bf16.mxu0 %v4196_v0  ;;  %3892 = vmatprep.subr.bf16.mxu1 %v4196_v0 }
  0xe8   : > { %v491_v27 = vpop.f32.mrb[0].mxu0  ;;  %v537_v28 = vpop.f32.mrb[0].mxu1 }
  0xe9   : > { %v819_v29 = vpack.c.bf16 %v537_v28, %v491_v27  ;;  %v3822_v30 = vpop.f32.mrb[1].mxu0  ;;  %v3828_v31 = vpop.f32.mrb[1].mxu1 }
  0xea   : > { %v494_v32 = vpop.f32.mrb[2].mxu0  ;;  %v540_v33 = vpop.f32.mrb[2].mxu1 }
  0xeb   : > { %v3823_v34 = vpop.f32.mrb[3].mxu0  ;;  %v3829_v35 = vpop.f32.mrb[3].mxu1  ;;  %3868 = vmatprep.mubr.msk.bf16.mxu0 %vm449_vm2, %v819_v29 }
  0xf0   : > { %v583_v36 = vpop.f32.mrb[4].mxu0  ;;  %v629_v37 = vpop.f32.mrb[4].mxu1 }
  0xf1   : > { %v820_v38 = vpack.c.bf16 %v629_v37, %v583_v36  ;;  %v3834_v39 = vpop.f32.mrb[5].mxu0  ;;  %v3840_v40 = vpop.f32.mrb[5].mxu1 }
  0xf2   : > { %v586_v41 = vpop.f32.mrb[6].mxu0  ;;  %v632_v42 = vpop.f32.mrb[6].mxu1 }
  0xf3   : > { %v3835_v43 = vpop.f32.mrb[7].mxu0  ;;  %v3841_v44 = vpop.f32.mrb[7].mxu1  ;;  %3869 = vmatmul.mubr.msk.bf16.vlgmr.msra.gmra.mrb[16].mxu0 %vm449_vm2, %v820_v38  ;;  %v3555_v38 = vld [vmem:[%s4780_s5 + $0x1] ss:$0 sm:$0xff] }
  0xf8   : > { %v675_v45 = vpop.f32.mrb[8].mxu0  ;;  %v721_v46 = vpop.f32.mrb[8].mxu1 }
  0xf9   : > { %v821_v47 = vpack.c.bf16 %v721_v46, %v675_v45  ;;  %v3846_v48 = vpop.f32.mrb[9].mxu0  ;;  %v3852_v49 = vpop.f32.mrb[9].mxu1 }
  0xfa   : > { %v678_v50 = vpop.f32.mrb[10].mxu0  ;;  %v724_v51 = vpop.f32.mrb[10].mxu1 }
  0xfb   : > { %v3847_v52 = vpop.f32.mrb[11].mxu0  ;;  %v3853_v53 = vpop.f32.mrb[11].mxu1  ;;  %3872 = vmatprep.mubr.msk.bf16.mxu0 %vm449_vm2, %v821_v47 }
 0x100   : > { %v767_v54 = vpop.f32.mrb[12].mxu0  ;;  %v813_v55 = vpop.f32.mrb[12].mxu1 }
 0x101   : > { %v822_v56 = vpack.c.bf16 %v813_v55, %v767_v54  ;;  %v3858_v57 = vpop.f32.mrb[13].mxu0  ;;  %v3864_v58 = vpop.f32.mrb[13].mxu1 }
 0x102   : > { %v770_v59 = vpop.f32.mrb[14].mxu0  ;;  %v816_v60 = vpop.f32.mrb[14].mxu1 }
 0x103   : > { %v3859_v61 = vpop.f32.mrb[15].mxu0  ;;  %v3865_v62 = vpop.f32.mrb[15].mxu1  ;;  %3873 = vmatmul.mubr.msk.bf16.gmra.mrb[20].mxu0 %vm449_vm2, %v822_v56 }
 0x104   : > { %3888 = vmatprep.mubr.msk.bf16.mxu0 %vm4197_vm0, %v4196_v0 }
 0x1c6   : > { %v3870_v2 = vpop.f32.mrb[16].mxu0 }
 0x1c7   : > { %v887_v3 = vadd.f32 %v3870_v2, %v3548_v1  ;;  %v878_v4 = vpop.f32.mrb[17].mxu0 }
 0x1c8   : > { %v879_v5 = vadd.f32 %v3548_v1, %v878_v4  ;;  %v3871_v8 = vpop.f32.mrb[18].mxu0 }
 0x1c9   : > { %v890_v9 = vadd.f32 %v3871_v8, %v3548_v1  ;;  %v881_v10 = vpop.f32.mrb[19].mxu0  ;;  %v911_v12 = vmax.f32 %v887_v3, 0.0 }
 0x1ca   : > { %v882_v11 = vadd.f32 %v3548_v1, %v881_v10  ;;  %v909_v14 = vmax.f32 %v879_v5, 0.0 }
 0x1cb   : > { %v912_v13 = vmax.f32 %v890_v9, 0.0 }
 0x1cc   : > { %v910_v15 = vmax.f32 %v882_v11, 0.0 }
 0x1cd   : > { %v918_v16 = vpack.c.bf16 %v912_v13, %v911_v12 }
 0x1ce   : > { %v917_v17 = vpack.c.bf16 %v910_v15, %v909_v14 }
 0x1d0   : > { %3878 = vmatprep.mubr.msk.bf16.mxu1 %vm935_vm3, %v917_v17 }
 0x1d1   : > { %3879 = vmatmul.mubr.msk.bf16.vlgmr.msra.gmra.mrb[16].mxu1 %vm935_vm3, %v918_v16 }
 0x1d6   : > { %v3874_v18 = vpop.f32.mrb[20].mxu0 }
 0x1d7   : > { %v903_v25 = vadd.f32 %v3874_v18, %v3548_v1  ;;  %v894_v26 = vpop.f32.mrb[21].mxu0 }
 0x1d8   : > { %v895_v27 = vadd.f32 %v3548_v1, %v894_v26  ;;  %v3875_v28 = vpop.f32.mrb[22].mxu0 }
 0x1d9   : > { %v906_v29 = vadd.f32 %v3875_v28, %v3548_v1  ;;  %v897_v30 = vpop.f32.mrb[23].mxu0  ;;  %v915_v32 = vmax.f32 %v903_v25, 0.0 }
 0x1da   : > { %v898_v31 = vadd.f32 %v3548_v1, %v897_v30  ;;  %v913_v34 = vmax.f32 %v895_v27, 0.0 }
 0x1db   : > { %v916_v33 = vmax.f32 %v906_v29, 0.0 }
 0x1dc   : > { %v914_v35 = vmax.f32 %v898_v31, 0.0 }
 0x1dd   : > { %v920_v36 = vpack.c.bf16 %v916_v33, %v915_v32 }
 0x1de   : > { %v919_v37 = vpack.c.bf16 %v914_v35, %v913_v34 }
 0x1e0   : > { %3882 = vmatprep.mubr.msk.bf16.mxu1 %vm935_vm3, %v919_v37 }
 0x1e1   : > { %3883 = vmatmul.mubr.msk.bf16.gmra.mrb[20].mxu1 %vm935_vm3, %v920_v36 }
 0x1e2   : > { %3894 = vmatprep.mubr.msk.bf16.mxu1 %vm4197_vm0, %v4196_v0 }
 0x2a4   : > { %v3880_v39 = vpop.f32.mrb[16].mxu1 }
 0x2a5   : > { %v991_v40 = vadd.f32 %v3880_v39, %v3555_v38  ;;  %v982_v41 = vpop.f32.mrb[17].mxu1 }
 0x2a6   : > { %v983_v42 = vadd.f32 %v3555_v38, %v982_v41  ;;  %v3881_v43 = vpop.f32.mrb[18].mxu1 }
 0x2a7   : > { %v994_v44 = vadd.f32 %v3881_v43, %v3555_v38  ;;  %v985_v45 = vpop.f32.mrb[19].mxu1  ;;  %v1015_v46 = vmax.f32 %v991_v40, 0.0 }
 0x2a8   : > { %v1013_v47 = vmax.f32 %v983_v42, 0.0  ;;  %v986_v48 = vadd.f32 %v3555_v38, %v985_v45 }
 0x2a9   : > { %v1016_v50 = vmax.f32 %v994_v44, 0.0  ;;  %v1023_v52 = vpack.c.bf16 %v1015_v46, %v1015_v46 }
 0x2aa   : > { %v1021_v49 = vpack.c.bf16 %v1013_v47, %v1013_v47  ;;  %v1014_v51 = vmax.f32 %v986_v48, 0.0 }
 0x2ab   : > { %v1024_v55 = vpack.c.bf16 %v1016_v50, %v1016_v50  ;;  %v1116_v57 = vsel %vm453_vm1, %v1023_v52, 0 }
 0x2ac   : > { %v1022_v53 = vpack.c.bf16 %v1014_v51, %v1014_v51  ;;  %v1030_v54 = vsel %vm453_vm1, %v1021_v49, 0 }
 0x2ad   : > { %3887 = vmatpush3.bf16.msra.mxu0 %v1030_v54  ;;  %v1159_v58 = vsel %vm453_vm1, %v1024_v55, 0  ;;  %v4163_v54 = vld [vmem:[%s4302_s26] sm:$0xff]  }
 0x2ae   : > { %v1073_v56 = vsel %vm453_vm1, %v1022_v53, 0  ;;  %3898 = vmatprep.subr.bf16.mxu0 %v4196_v0  ;;  %v4162_v53 = vld [vmem:[%s4779_s4 + $0x18] sm:$0xff]   ;;  %v4445_v55 = vld [vmem:[%s4307_s29] sm:$0xff]  }
 0x2af   : > { %3893 = vmatpush3.bf16.msra.mxu1 %v1073_v56  ;;  %v4167_v56 = vld [vmem:[%s4302_s26 + $0x10] sm:$0xff]  }
 0x2b0   : > { %3889 = vmatmul.mubr.msk.bf16.vlgmr.msra.gmra.mrb[24].mxu0 %vm449_vm2, %v4285_v6  ;;  %3904 = vmatprep.subr.bf16.mxu1 %v4196_v0 }
 0x2b1   : > { %3899 = vmatpush3.bf16.msra.mxu0 %v1116_v57  ;;  %3900 = vmatprep.mubr.msk.bf16.mxu0 %vm4197_vm0, %v4196_v0  ;;  %v4454_v57 = vld [vmem:[%s4307_s29 + $0x10] sm:$0xff]  }
 0x2b2   : > { %3895 = vmatmul.mubr.msk.bf16.vlgmr.msra.gmra.mrb[24].mxu1 %vm449_vm2, %v4288_v7  ;;  %3910 = vmatprep.subr.bf16.mxu0 %v4196_v0 }
 0x2b3   : > { %3905 = vmatpush3.bf16.msra.mxu1 %v1159_v58  ;;  %3906 = vmatprep.mubr.msk.bf16.mxu1 %vm4197_vm0, %v4196_v0  ;;  %v4171_v58 = vld [vmem:[%s4302_s26 + $0x20] sm:$0xff]  }
 0x2b4   : > { %v3884_v6 = vpop.f32.mrb[20].mxu1  ;;  %3916 = vmatprep.subr.bf16.mxu1 %v4196_v0 }
 0x2b5   : > { %v1007_v59 = vadd.f32 %v3884_v6, %v3555_v38  ;;  %v998_v60 = vpop.f32.mrb[21].mxu1  ;;  %v4463_v6 = vld [vmem:[%s4307_s29 + $0x20] sm:$0xff]  }
 0x2b6   : > { %v999_v61 = vadd.f32 %v3555_v38, %v998_v60  ;;  %v3885_v62 = vpop.f32.mrb[22].mxu1  ;;  %v4472_v60 = vld [vmem:[%s4307_s29 + $0x30] sm:$0xff]  }
 0x2b7   : > { %v1010_v63 = vadd.f32 %v3885_v62, %v3555_v38  ;;  %v1001_v1 = vpop.f32.mrb[23].mxu1  ;;  %v1019_v2 = vmax.f32 %v1007_v59, 0.0  ;;  %v4175_v59 = vld [vmem:[%s4302_s26 + $0x30] sm:$0xff]  }
 0x2b8   : > { %v1017_v3 = vmax.f32 %v999_v61, 0.0  ;;  %v1002_v7 = vadd.f32 %v3555_v38, %v1001_v1  ;;  %3901 = vmatmul.mubr.msk.bf16.vlgmr.msra.gmra.mrb[28].mxu0 %vm449_vm2, %v4318_v19  ;;  %v3571_v61 = vld [vmem:[%s4780_s5 + $0x2] ss:$0 sm:$0xff] }
 0x2b9   : > { %3912 = vmatprep.mubr.msk.bf16.mxu0 %vm4197_vm0, %v4196_v0  ;;  %v1020_v5 = vmax.f32 %v1010_v63, 0.0  ;;  %v1027_v9 = vpack.c.bf16 %v1019_v2, %v1019_v2 }
 0x2ba   : > { %v1025_v4 = vpack.c.bf16 %v1017_v3, %v1017_v3  ;;  %v1018_v8 = vmax.f32 %v1002_v7, 0.0  ;;  %3907 = vmatmul.mubr.msk.bf16.vlgmr.msra.gmra.mrb[28].mxu1 %vm449_vm2, %v4321_v20 }
 0x2bb   : > { %3918 = vmatprep.mubr.msk.bf16.mxu1 %vm4197_vm0, %v4196_v0  ;;  %v1028_v12 = vpack.c.bf16 %v1020_v5, %v1020_v5  ;;  %v1288_v13 = vsel %vm453_vm1, %v1027_v9, 0 }
 0x2bc   : > { %v1026_v10 = vpack.c.bf16 %v1018_v8, %v1018_v8  ;;  %v1202_v11 = vsel %vm453_vm1, %v1025_v4, 0 }
 0x2bd   : > { %3911 = vmatpush3.bf16.msra.mxu0 %v1202_v11  ;;  %v1331_v20 = vsel %vm453_vm1, %v1028_v12, 0 }
 0x2be   : > { %v1245_v19 = vsel %vm453_vm1, %v1026_v10, 0  ;;  %3922 = vmatprep.subr.bf16.mxu0 %v4196_v0 }
 0x2bf   : > { %3917 = vmatpush3.bf16.msra.mxu1 %v1245_v19 }
 0x2c0   : > { %3913 = vmatmul.mubr.msk.bf16.vlgmr.msra.gmra.mrb[32].mxu0 %vm449_vm2, %v4334_v21  ;;  %3928 = vmatprep.subr.bf16.mxu1 %v4196_v0  ;;  %v4161_v21 = vld [vmem:[%s4779_s4 + $0x10] sm:$0xff]  }
 0x2c1   : > { %3923 = vmatpush3.bf16.msra.mxu0 %v1288_v13  ;;  %3924 = vmatprep.mubr.msk.bf16.mxu0 %vm4197_vm0, %v4196_v0  ;;  %v4165_v13 = vld [vmem:[%s4302_s26 + $0x8] sm:$0xff]  }
 0x2c2   : > { %3919 = vmatmul.mubr.msk.bf16.vlgmr.msra.gmra.mrb[32].mxu1 %vm449_vm2, %v4337_v22  ;;  %3934 = vmatprep.subr.bf16.mxu0 %v4161_v21 }
 0x2c3   : > { %3929 = vmatpush3.bf16.msra.mxu1 %v1331_v20  ;;  %3930 = vmatprep.mubr.msk.bf16.mxu1 %vm4197_vm0, %v4196_v0 }
 0x2c4   : > { %3944 = vmatprep.subr.bf16.mxu1 %v4162_v53 }
 0x2c8   : > { %3925 = vmatmul.mubr.msk.bf16.vlgmr.msra.gmra.mrb[36].mxu0 %vm449_vm2, %v4350_v23 }
 0x2c9   : > { %3935 = vmatpush3.bf16.msra.mxu0 %v4161_v21 }
 0x2ca   : > { %3931 = vmatmul.mubr.msk.bf16.vlgmr.msra.gmra.mrb[36].mxu1 %vm449_vm2, %v4353_v24  ;;  %3954 = vmatprep.subr.bf16.mxu0 %v4196_v0 }
 0x2cb   : > { %3945 = vmatpush3.bf16.msra.mxu1 %v4162_v53 }
 0x2cc   : > { %3960 = vmatprep.subr.bf16.mxu1 %v4196_v0 }
 0x383   : > { %v1066_v22 = vpop.f32.mrb[24].mxu0 }
 0x384   : > { %v3890_v14 = vpop.f32.mrb[25].mxu0 }
 0x385   : > { %v1069_v15 = vpop.f32.mrb[26].mxu0  ;;  %v1109_v16 = vpop.f32.mrb[24].mxu1 }
 0x386   : > { %v1373_v17 = vpack.c.bf16 %v1109_v16, %v1066_v22  ;;  %v3891_v18 = vpop.f32.mrb[27].mxu0  ;;  %v3896_v25 = vpop.f32.mrb[25].mxu1 }
 0x387   : > { %v1112_v26 = vpop.f32.mrb[26].mxu1 }
 0x388   : > { %v3897_v23 = vpop.f32.mrb[27].mxu1  ;;  %3936 = vmatprep.mubr.msk.bf16.mxu0 %vm935_vm3, %v1373_v17 }
 0x38b   : > { %v1152_v24 = vpop.f32.mrb[28].mxu0 }
 0x38c   : > { %v3902_v27 = vpop.f32.mrb[29].mxu0 }
 0x38d   : > { %v1155_v28 = vpop.f32.mrb[30].mxu0  ;;  %v1195_v29 = vpop.f32.mrb[28].mxu1 }
 0x38e   : > { %v1374_v30 = vpack.c.bf16 %v1195_v29, %v1152_v24  ;;  %v3903_v31 = vpop.f32.mrb[31].mxu0  ;;  %v3908_v32 = vpop.f32.mrb[29].mxu1  ;;  %v4488_v29 = vld [vmem:[%s4307_s29 + $0x8] sm:$0xff]  }
 0x38f   : > { %v1198_v33 = vpop.f32.mrb[30].mxu1  ;;  %v4497_v31 = vld [vmem:[%s4307_s29 + $0x18] sm:$0xff]   ;;  %v4172_v32 = vld [vmem:[%s4302_s26 + $0x28] sm:$0xff]  }
 0x390   : > { %v3909_v34 = vpop.f32.mrb[31].mxu1  ;;  %3937 = vmatmul.mubr.msk.bf16.vlgmr.msra.gmra.mrb[40].mxu0 %vm935_vm3, %v1374_v30  ;;  %v4168_v30 = vld [vmem:[%s4302_s26 + $0x18] sm:$0xff]   ;;  %v4506_v33 = vld [vmem:[%s4307_s29 + $0x28] sm:$0xff]  }
 0x391   : > { %3955 = vmatpush3.bf16.msra.mxu0 %v4163_v54  ;;  %v4176_v34 = vld [vmem:[%s4302_s26 + $0x38] sm:$0xff]   ;;  %s3539_s26 = sshll.u32 %s4789_s14, 3 }
 0x392   : > { %3966 = vmatprep.subr.bf16.mxu0 %v4196_v0  ;;  %s431_s11 = scalar_lea.vmem %s4785_s10, %s3539_s26 }
 0x393   : > { %v1238_v35 = vpop.f32.mrb[32].mxu0 }
 0x394   : > { %v3914_v36 = vpop.f32.mrb[33].mxu0 }
 0x395   : > { %v1241_v37 = vpop.f32.mrb[34].mxu0  ;;  %v1281_v38 = vpop.f32.mrb[32].mxu1 }
 0x396   : > { %v1375_v39 = vpack.c.bf16 %v1281_v38, %v1238_v35  ;;  %v3915_v40 = vpop.f32.mrb[35].mxu0  ;;  %v3920_v41 = vpop.f32.mrb[33].mxu1  ;;  %v4514_v35 = vld [vmem:[%s4307_s29 + $0x38] sm:$0xff]  }
 0x397   : > { %v1284_v42 = vpop.f32.mrb[34].mxu1  ;;  %v2115_v41 = vld [vmem:[%s4781_s6] sm:$0xf] }
 0x398   : > { %v3921_v43 = vpop.f32.mrb[35].mxu1  ;;  %3940 = vmatprep.mubr.msk.bf16.mxu0 %vm935_vm3, %v1375_v39  ;;  %v2146_v42 = vsel %vm453_vm1, %v2115_v41, 0 }
 0x39b   : > { %v1324_v44 = vpop.f32.mrb[36].mxu0 }
 0x39c   : > { %v3926_v45 = vpop.f32.mrb[37].mxu0 }
 0x39d   : > { %v1327_v46 = vpop.f32.mrb[38].mxu0  ;;  %v1367_v47 = vpop.f32.mrb[36].mxu1 }
 0x39e   : > { %v1376_v48 = vpack.c.bf16 %v1367_v47, %v1324_v44  ;;  %v3927_v49 = vpop.f32.mrb[39].mxu0  ;;  %v3932_v50 = vpop.f32.mrb[37].mxu1 }
 0x39f   : > { %v1370_v51 = vpop.f32.mrb[38].mxu1 }
 0x3a0   : > { %v3933_v52 = vpop.f32.mrb[39].mxu1  ;;  %3941 = vmatmul.mubr.msk.bf16.gmra.mrb[44].mxu0 %vm935_vm3, %v1376_v48 }
 0x3a1   : > { %3956 = vmatprep.mubr.msk.bf16.mxu0 %vm4197_vm0, %v4196_v0 }
 0x3a8   : > { %3957 = vmatmul.mubr.msk.bf16.vlgmr.msra.gmra.mrb[48].mxu0 %vm935_vm3, %v4445_v55 }
 0x3a9   : > { %3968 = vmatprep.mubr.msk.bf16.mxu0 %vm4197_vm0, %v4196_v0  ;;  %3967 = vmatpush3.bf16.msra.mxu0 %v4167_v56 }
 0x3aa   : > { %3978 = vmatprep.subr.bf16.mxu0 %v4196_v0 }
 0x3b0   : > { %3969 = vmatmul.mubr.msk.bf16.vlgmr.msra.gmra.mrb[52].mxu0 %vm935_vm3, %v4454_v57 }
 0x3b1   : > { %3980 = vmatprep.mubr.msk.bf16.mxu0 %vm4197_vm0, %v4196_v0  ;;  %3979 = vmatpush3.bf16.msra.mxu0 %v4171_v58 }
 0x3b2   : > { %3990 = vmatprep.subr.bf16.mxu0 %v4196_v0 }
 0x3b8   : > { %3981 = vmatmul.mubr.msk.bf16.vlgmr.msra.gmra.mrb[56].mxu0 %vm935_vm3, %v4463_v6 }
 0x3b9   : > { %3992 = vmatprep.mubr.msk.bf16.mxu0 %vm4197_vm0, %v4196_v0  ;;  %3991 = vmatpush3.bf16.msra.mxu0 %v4175_v59 }
 0x3ba   : > { %4147 = vmatprep.subr.msk.bf16.mxu0 %vm453_vm1, %v2115_v41 }
 0x3c0   : > { %3993 = vmatmul.mubr.msk.bf16.vlgmr.msra.gmra.mrb[60].mxu0 %vm935_vm3, %v4472_v60 }
 0x3c1   : > { %4003 = vmatpush3.bf16.msra.mxu0 %v2146_v42 }
 0x3c2   : > { %4040 = vmatprep.subr.bf16.mxu0 %v4196_v0 }
 0x463   : > { %v3938_v62 = vpop.f32.mrb[40].mxu0 }
 0x464   : > { %v1446_v63 = vadd.f32 %v3938_v62, %v3571_v61  ;;  %v1437_v1 = vpop.f32.mrb[41].mxu0 }
 0x465   : > { %v1438_v2 = vadd.f32 %v3571_v61, %v1437_v1  ;;  %v3939_v3 = vpop.f32.mrb[42].mxu0 }
 0x466   : > { %v1449_v7 = vadd.f32 %v3939_v3, %v3571_v61  ;;  %v1440_v4 = vpop.f32.mrb[43].mxu0  ;;  %v1470_v8 = vmax.f32 %v1446_v63, 0.0 }
 0x467   : > { %v1441_v5 = vadd.f32 %v3571_v61, %v1440_v4  ;;  %v1468_v10 = vmax.f32 %v1438_v2, 0.0 }
 0x468   : > { %v1471_v9 = vmax.f32 %v1449_v7, 0.0 }
 0x469   : > { %v1469_v11 = vmax.f32 %v1441_v5, 0.0 }
 0x46a   : > { %v1477_v12 = vpack.c.bf16 %v1471_v9, %v1470_v8 }
 0x46b   : > { %v1476_v19 = vpack.c.bf16 %v1469_v11, %v1468_v10 }
 0x46d   : > { %3946 = vmatprep.mubr.msk.bf16.mxu1 %vm935_vm3, %v1476_v19 }
 0x46e   : > { %3947 = vmatmul.mubr.msk.bf16.vlgmr.msra.gmra.mrb[40].mxu1 %vm935_vm3, %v1477_v12 }
 0x46f   : > { %3961 = vmatpush3.bf16.msra.mxu1 %v4165_v13 }
 0x470   : > { %3972 = vmatprep.subr.bf16.mxu1 %v4196_v0 }
 0x473   : > { %v3942_v20 = vpop.f32.mrb[44].mxu0 }
 0x474   : > { %v1462_v21 = vadd.f32 %v3942_v20, %v3571_v61  ;;  %v1453_v22 = vpop.f32.mrb[45].mxu0 }
 0x475   : > { %v1454_v14 = vadd.f32 %v3571_v61, %v1453_v22  ;;  %v3943_v15 = vpop.f32.mrb[46].mxu0 }
 0x476   : > { %v1465_v16 = vadd.f32 %v3943_v15, %v3571_v61  ;;  %v1456_v17 = vpop.f32.mrb[47].mxu0  ;;  %v1474_v25 = vmax.f32 %v1462_v21, 0.0 }
 0x477   : > { %v1457_v18 = vadd.f32 %v3571_v61, %v1456_v17  ;;  %v1472_v23 = vmax.f32 %v1454_v14, 0.0  ;;  %v3579_v61 = vld [vmem:[%s4780_s5 + $0x3] ss:$0 sm:$0xff] }
 0x478   : > { %v1475_v26 = vmax.f32 %v1465_v16, 0.0 }
 0x479   : > { %v1473_v24 = vmax.f32 %v1457_v18, 0.0 }
 0x47a   : > { %v1479_v27 = vpack.c.bf16 %v1475_v26, %v1474_v25 }
 0x47b   : > { %v1478_v28 = vpack.c.bf16 %v1473_v24, %v1472_v23  ;;  %v1715_v36 = vpop.f32.mrb[48].mxu0 }
 0x47c   : > { %v3958_v37 = vpop.f32.mrb[49].mxu0 }
 0x47d   : > { %3950 = vmatprep.mubr.msk.bf16.mxu1 %vm935_vm3, %v1478_v28  ;;  %v1718_v38 = vpop.f32.mrb[50].mxu0 }
 0x47e   : > { %3951 = vmatmul.mubr.msk.bf16.gmra.mrb[44].mxu1 %vm935_vm3, %v1479_v27  ;;  %v3959_v39 = vpop.f32.mrb[51].mxu0  ;;  %v2107_v40 = vpack.c.bf16 %v1718_v38, %v1715_v36 }
 0x47f   : > { %3962 = vmatprep.mubr.msk.bf16.mxu1 %vm4197_vm0, %v4196_v0 }
 0x480   : > { %4004 = vmatprep.mubr.msk.bf16.mxu0 %vm449_vm2, %v2107_v40 }
 0x483   : > { %v4525_v43 = vpop.f32.mrb[52].mxu0 }
 0x484   : > { %v3970_v44 = vpop.f32.mrb[53].mxu0 }
 0x485   : > { %v4527_v45 = vpop.f32.mrb[54].mxu0 }
 0x486   : > { %3963 = vmatmul.mubr.msk.bf16.vlgmr.msra.gmra.mrb[48].mxu1 %vm935_vm3, %v4488_v29  ;;  %v3971_v46 = vpop.f32.mrb[55].mxu0  ;;  %v2109_v47 = vpack.c.bf16 %v4527_v45, %v4525_v43 }
 0x487   : > { %3973 = vmatpush3.bf16.msra.mxu1 %v4168_v30  ;;  %3974 = vmatprep.mubr.msk.bf16.mxu1 %vm4197_vm0, %v4196_v0 }
 0x488   : > { %3984 = vmatprep.subr.bf16.mxu1 %v4196_v0 }
 0x48b   : > { %v4531_v48 = vpop.f32.mrb[56].mxu0 }
 0x48c   : > { %v3982_v49 = vpop.f32.mrb[57].mxu0 }
 0x48d   : > { %v4533_v50 = vpop.f32.mrb[58].mxu0 }
 0x48e   : > { %3975 = vmatmul.mubr.msk.bf16.vlgmr.msra.gmra.mrb[52].mxu1 %vm935_vm3, %v4497_v31  ;;  %v3983_v51 = vpop.f32.mrb[59].mxu0  ;;  %v2111_v52 = vpack.c.bf16 %v4533_v50, %v4531_v48 }
 0x48f   : > { %3985 = vmatpush3.bf16.msra.mxu1 %v4172_v32  ;;  %3986 = vmatprep.mubr.msk.bf16.mxu1 %vm4197_vm0, %v4196_v0 }
 0x490   : > { %3996 = vmatprep.subr.bf16.mxu1 %v4196_v0 }
 0x493   : > { %v4537_v53 = vpop.f32.mrb[60].mxu0 }
 0x494   : > { %v3994_v54 = vpop.f32.mrb[61].mxu0 }
 0x495   : > { %v4539_v56 = vpop.f32.mrb[62].mxu0 }
 0x496   : > { %3987 = vmatmul.mubr.msk.bf16.vlgmr.msra.gmra.mrb[56].mxu1 %vm935_vm3, %v4506_v33  ;;  %v3995_v58 = vpop.f32.mrb[63].mxu0  ;;  %v2113_v59 = vpack.c.bf16 %v4539_v56, %v4537_v53  ;;  %v4180_v53 = vld [vmem:[%s4781_s6 + $0x18] sm:$0xff]   ;;  %v3609_v56 = vld [vmem:[%s4782_s7] ss:$0 sm:$0xff] }
 0x497   : > { %3997 = vmatpush3.bf16.msra.mxu1 %v4176_v34  ;;  %3998 = vmatprep.mubr.msk.bf16.mxu1 %vm4197_vm0, %v4196_v0 }
 0x49e   : > { %3999 = vmatmul.mubr.msk.bf16.vlgmr.msra.gmra.mrb[60].mxu1 %vm935_vm3, %v4514_v35 }
 0x541   : > { %v3948_v62 = vpop.f32.mrb[40].mxu1 }
 0x542   : > { %v1549_v63 = vadd.f32 %v3948_v62, %v3579_v61  ;;  %v1540_v1 = vpop.f32.mrb[41].mxu1 }
 0x543   : > { %v1541_v2 = vadd.f32 %v3579_v61, %v1540_v1  ;;  %v3949_v3 = vpop.f32.mrb[42].mxu1 }
 0x544   : > { %v1573_v7 = vmax.f32 %v1549_v63, 0.0  ;;  %v1552_v4 = vadd.f32 %v3949_v3, %v3579_v61  ;;  %v1543_v5 = vpop.f32.mrb[43].mxu1 }
 0x545   : > { %v1571_v8 = vmax.f32 %v1541_v2, 0.0  ;;  %v1544_v9 = vadd.f32 %v3579_v61, %v1543_v5 }
 0x546   : > { %v1593_v10 = vsel %vm935_vm3, %v1573_v7, 0.0  ;;  %v1574_v11 = vmax.f32 %v1552_v4, 0.0 }
 0x547   : > { %v1594_v12 = vrot.slane %v1593_v10, 4  ;;  %v1579_v19 = vsel %vm935_vm3, %v1571_v8, 0.0  ;;  %v1572_v13 = vmax.f32 %v1544_v9, 0.0 }
 0x548   : > { %v1580_v20 = vrot.slane %v1579_v19, 4  ;;  %v1600_v21 = vsel %vm935_vm3, %v1574_v11, 0.0 }
 0x549   : > { %v1595_v22 = vadd.f32 %v1594_v12, %v1593_v10  ;;  %v1601_v14 = vrot.slane %v1600_v21, 4  ;;  %v1586_v15 = vsel %vm935_vm3, %v1572_v13, 0.0 }
 0x54a   : > { %v1581_v16 = vadd.f32 %v1580_v20, %v1579_v19  ;;  %v1587_v17 = vrot.slane %v1586_v15, 4 }
 0x54b   : > { %v1596_v18 = vrot.slane %v1595_v22, 2  ;;  %v1602_v25 = vadd.f32 %v1601_v14, %v1600_v21 }
 0x54c   : > { %v1582_v26 = vrot.slane %v1581_v16, 2  ;;  %v1588_v23 = vadd.f32 %v1587_v17, %v1586_v15 }
 0x54d   : > { %v1597_v24 = vadd.f32 %v1596_v18, %v1595_v22  ;;  %v1603_v27 = vrot.slane %v1602_v25, 2 }
 0x54e   : > { %v1583_v28 = vadd.f32 %v1582_v26, %v1581_v16  ;;  %v1589_v30 = vrot.slane %v1588_v23, 2 }
 0x54f   : > { %v1598_v32 = vrot.slane %v1597_v24, 1  ;;  %v1604_v34 = vadd.f32 %v1603_v27, %v1602_v25 }
 0x550   : > { %v1584_v36 = vrot.slane %v1583_v28, 1  ;;  %v1590_v37 = vadd.f32 %v1589_v30, %v1588_v23 }
 0x551   : > { %v1599_v38 = vadd.f32 %v1598_v32, %v1597_v24  ;;  %v1605_v39 = vrot.slane %v1604_v34, 1  ;;  %v3952_v40 = vpop.f32.mrb[44].mxu1 }
 0x552   : > { %v1585_v41 = vadd.f32 %v1584_v36, %v1583_v28  ;;  %v1591_v42 = vrot.slane %v1590_v37, 1  ;;  %v1565_v44 = vadd.f32 %v3952_v40, %v3579_v61  ;;  %v1556_v46 = vpop.f32.mrb[45].mxu1 }
 0x553   : > { %v1606_v49 = vadd.f32 %v1605_v39, %v1604_v34  ;;  %v1557_v51 = vadd.f32 %v3579_v61, %v1556_v46  ;;  %v3953_v54 = vpop.f32.mrb[46].mxu1  ;;  %v3173_v3 = vpack.c.bf16 %v1599_v38, %v1599_v38 }
 0x554   : > { %v3171_v58 = vpack.c.bf16 %v1585_v41, %v1585_v41  ;;  %v1592_v62 = vadd.f32 %v1591_v42, %v1590_v37  ;;  %v1577_v63 = vmax.f32 %v1565_v44, 0.0  ;;  %v1568_v1 = vadd.f32 %v3953_v54, %v3579_v61  ;;  %v1559_v2 = vpop.f32.mrb[47].mxu1 }
 0x555   : > { %v1575_v7 = vmax.f32 %v1557_v51, 0.0  ;;  %v1560_v4 = vadd.f32 %v3579_v61, %v1559_v2  ;;  %v3174_v5 = vpack.c.bf16 %v1606_v49, %v1606_v49  ;;  %v3282_v14 = vunpack.c.l.b16 %v3173_v3 }
 0x556   : > { %v3172_v8 = vpack.c.bf16 %v1592_v62, %v1592_v62  ;;  %v1621_v9 = vsel %vm935_vm3, %v1577_v63, 0.0  ;;  %v1578_v10 = vmax.f32 %v1568_v1, 0.0  ;;  %v3280_v13 = vunpack.c.l.b16 %v3171_v58 }
 0x557   : > { %v1622_v11 = vrot.slane %v1621_v9, 4  ;;  %v1607_v12 = vsel %vm935_vm3, %v1575_v7, 0.0  ;;  %v1576_v19 = vmax.f32 %v1560_v4, 0.0  ;;  %v3283_v18 = vunpack.c.l.b16 %v3174_v5 }
 0x558   : > { %v3281_v20 = vunpack.c.l.b16 %v3172_v8  ;;  %v1608_v21 = vrot.slane %v1607_v12, 4  ;;  %v1628_v22 = vsel %vm935_vm3, %v1578_v10, 0.0 }
 0x559   : > { %v1623_v15 = vadd.f32 %v1622_v11, %v1621_v9  ;;  %v1629_v16 = vrot.slane %v1628_v22, 4  ;;  %v1614_v61 = vsel %vm935_vm3, %v1576_v19, 0.0  ;;  %v1770_v17 = vpop.f32.mrb[48].mxu1 }
 0x55a   : > { %v3288_v25 = vsel %vm3208_vm4, %v3281_v20, %v3280_v13  ;;  %v1609_v26 = vadd.f32 %v1608_v21, %v1607_v12  ;;  %v1615_v23 = vrot.slane %v1614_v61, 4  ;;  %v3964_v24 = vpop.f32.mrb[49].mxu1 }
 0x55b   : > { %v3289_v27 = vsel %vm3210_vm5, %v3282_v14, %v3288_v25  ;;  %v1624_v28 = vrot.slane %v1623_v15, 2  ;;  %v1630_v30 = vadd.f32 %v1629_v16, %v1628_v22  ;;  %v1773_v32 = vpop.f32.mrb[50].mxu1 }
 0x55c   : > { %v1610_v34 = vrot.slane %v1609_v26, 2  ;;  %v3290_v36 = vsel %vm3212_vm6, %v3283_v18, %v3289_v27  ;;  %v1616_v37 = vadd.f32 %v1615_v23, %v1614_v61  ;;  %v2108_v38 = vpack.c.bf16 %v1773_v32, %v1770_v17  ;;  %v3965_v39 = vpop.f32.mrb[51].mxu1  ;;  %v4179_v23 = vld [vmem:[%s4781_s6 + $0x10] sm:$0xff]  }
 0x55d   : > { %v1625_v40 = vadd.f32 %v1624_v28, %v1623_v15  ;;  %v1631_v41 = vrot.slane %v1630_v30, 2  ;;  %4020 = vmatprep.subr.bf16.mxu1 %v4179_v23 }
 0x55e   : > { %v1611_v42 = vadd.f32 %v1610_v34, %v1609_v26  ;;  %v1617_v44 = vrot.slane %v1616_v37, 2  ;;  %4005 = vmatmul.mubr.msk.bf16.vlgmr.msra.gmra.mrb[64].mxu0 %vm449_vm2, %v2108_v38  ;;  %4021 = vmatpush3.bf16.msra.mxu1 %v4179_v23 }
 0x55f   : > { %v1626_v46 = vrot.slane %v1625_v40, 1  ;;  %v1632_v49 = vadd.f32 %v1631_v41, %v1630_v30  ;;  %4008 = vmatprep.mubr.msk.bf16.mxu0 %vm449_vm2, %v2109_v47  ;;  %4022 = vmatprep.subr.bf16.mxu1 %v4180_v53 }
 0x560   : > { %v1612_v51 = vrot.slane %v1611_v42, 1  ;;  %v1618_v54 = vadd.f32 %v1617_v44, %v1616_v37 }
 0x561   : > { %v1627_v58 = vadd.f32 %v1626_v46, %v1625_v40  ;;  %v1633_v62 = vrot.slane %v1632_v49, 1  ;;  %v1880_v63 = vpop.f32.mrb[52].mxu1 }
 0x562   : > { %v1613_v1 = vadd.f32 %v1612_v51, %v1611_v42  ;;  %v1619_v2 = vrot.slane %v1618_v54, 1  ;;  %v3976_v3 = vpop.f32.mrb[53].mxu1  ;;  %4023 = vmatpush3.bf16.msra.mxu1 %v4180_v53 }
 0x563   : > { %v1634_v7 = vadd.f32 %v1633_v62, %v1632_v49  ;;  %v1883_v4 = vpop.f32.mrb[54].mxu1  ;;  %v3177_v11 = vpack.c.bf16 %v1627_v58, %v1627_v58  ;;  %4046 = vmatprep.subr.bf16.mxu1 %v4196_v0 }
 0x564   : > { %v3175_v5 = vpack.c.bf16 %v1613_v1, %v1613_v1  ;;  %v1620_v8 = vadd.f32 %v1619_v2, %v1618_v54  ;;  %v2110_v9 = vpack.c.bf16 %v1883_v4, %v1880_v63  ;;  %v3977_v10 = vpop.f32.mrb[55].mxu1 }
 0x565   : > { %v3178_v43 = vpack.c.bf16 %v1634_v7, %v1634_v7  ;;  %v3286_v13 = vunpack.c.l.b16 %v3177_v11 }
 0x566   : > { %v3284_v12 = vunpack.c.l.b16 %v3175_v5  ;;  %v3176_v45 = vpack.c.bf16 %v1620_v8, %v1620_v8  ;;  %4009 = vmatmul.mubr.msk.bf16.gmra.mrb[68].mxu0 %vm449_vm2, %v2110_v9 }
 0x567   : > { %4012 = vmatprep.mubr.msk.bf16.mxu0 %vm449_vm2, %v2111_v52  ;;  %v3287_v21 = vunpack.c.l.b16 %v3178_v43 }
 0x568   : > { %v3291_v47 = vsel %vm3214_vm7, %v3284_v12, %v3290_v36  ;;  %v3285_v19 = vunpack.c.l.b16 %v3176_v45 }
 0x569   : > { %v1990_v20 = vpop.f32.mrb[56].mxu1 }
 0x56a   : > { %v3292_v22 = vsel %vm3216_vm8, %v3285_v19, %v3291_v47  ;;  %v3988_v14 = vpop.f32.mrb[57].mxu1 }
 0x56b   : > { %v3293_v15 = vsel %vm3218_vm9, %v3286_v13, %v3292_v22  ;;  %v1993_v16 = vpop.f32.mrb[58].mxu1 }
 0x56c   : > { %v2112_v61 = vpack.c.bf16 %v1993_v16, %v1990_v20  ;;  %v3989_v17 = vpop.f32.mrb[59].mxu1  ;;  %v4571_v48 = vsel %vm3220_vm10, %v3287_v21, %v3293_v15 }
 0x56e   : > { %4013 = vmatmul.mubr.msk.bf16.gmra.mrb[72].mxu0 %vm449_vm2, %v2112_v61 }
 0x56f   : > { %4016 = vmatprep.mubr.msk.bf16.mxu0 %vm449_vm2, %v2113_v59 }
 0x571   : > { %v2100_v50 = vpop.f32.mrb[60].mxu1 }
 0x572   : > { %v4000_v52 = vpop.f32.mrb[61].mxu1 }
 0x573   : > { %v2103_v18 = vpop.f32.mrb[62].mxu1 }
 0x574   : > { %v2114_v25 = vpack.c.bf16 %v2103_v18, %v2100_v50  ;;  %v4001_v26 = vpop.f32.mrb[63].mxu1 }
 0x576   : > { %4017 = vmatmul.mubr.msk.bf16.gmra.mrb[76].mxu0 %vm449_vm2, %v2114_v25 }
 0x577   : > { %4042 = vmatprep.mubr.msk.bf16.mxu0 %vm4197_vm0, %v4196_v0 }
 0x631   : > { %v4006_v59 = vpop.f32.mrb[64].mxu0 }
 0x632   : > { %v2191_v24 = vadd.f32 %v4006_v59, %v3609_v56  ;;  %v2182_v27 = vpop.f32.mrb[65].mxu0 }
 0x633   : > { %v2183_v28 = vadd.f32 %v3609_v56, %v2182_v27  ;;  %v4007_v30 = vpop.f32.mrb[66].mxu0 }
 0x634   : > { %v2194_v32 = vadd.f32 %v4007_v30, %v3609_v56  ;;  %v2185_v34 = vpop.f32.mrb[67].mxu0  ;;  %v2247_v37 = vmax.f32 %v2191_v24, 0.0 }
 0x635   : > { %v2186_v36 = vadd.f32 %v3609_v56, %v2185_v34  ;;  %v2245_v39 = vmax.f32 %v2183_v28, 0.0  ;;  %v4604_v28 = vld [vmem:[%s4782_s7 + $0x1] ss:$0 sm:$0xff] }
 0x636   : > { %v2248_v38 = vmax.f32 %v2194_v32, 0.0 }
 0x637   : > { %v2246_v40 = vmax.f32 %v2186_v36, 0.0 }
 0x638   : > { %v2262_v41 = vpack.c.bf16 %v2248_v38, %v2247_v37 }
 0x639   : > { %v2261_v42 = vpack.c.bf16 %v2246_v40, %v2245_v39  ;;  %v4010_v44 = vpop.f32.mrb[68].mxu0 }
 0x63a   : > { %v2207_v46 = vadd.f32 %v4010_v44, %v3609_v56  ;;  %v2198_v49 = vpop.f32.mrb[69].mxu0 }
 0x63b   : > { %v2199_v51 = vadd.f32 %v3609_v56, %v2198_v49  ;;  %v4011_v54 = vpop.f32.mrb[70].mxu0  ;;  %4024 = vmatprep.mubr.msk.bf16.mxu1 %vm2291_vm11, %v2261_v42 }
 0x63c   : > { %v2210_v58 = vadd.f32 %v4011_v54, %v3609_v56  ;;  %v2201_v62 = vpop.f32.mrb[71].mxu0  ;;  %4025 = vmatmul.mubr.msk.bf16.vlgmr.msra.gmra.mrb[64].mxu1 %vm2291_vm11, %v2262_v41  ;;  %v2251_v1 = vmax.f32 %v2207_v46, 0.0 }
 0x63d   : > { %v2202_v63 = vadd.f32 %v3609_v56, %v2201_v62  ;;  %v2249_v3 = vmax.f32 %v2199_v51, 0.0 }
 0x63e   : > { %v2252_v2 = vmax.f32 %v2210_v58, 0.0 }
 0x63f   : > { %v2250_v7 = vmax.f32 %v2202_v63, 0.0 }
 0x640   : > { %v2264_v4 = vpack.c.bf16 %v2252_v2, %v2251_v1 }
 0x641   : > { %v2263_v5 = vpack.c.bf16 %v2250_v7, %v2249_v3  ;;  %v4014_v8 = vpop.f32.mrb[72].mxu0 }
 0x642   : > { %v2223_v9 = vadd.f32 %v4014_v8, %v3609_v56  ;;  %v2214_v10 = vpop.f32.mrb[73].mxu0 }
 0x643   : > { %v2215_v11 = vadd.f32 %v3609_v56, %v2214_v10  ;;  %v4015_v12 = vpop.f32.mrb[74].mxu0  ;;  %4028 = vmatprep.mubr.msk.bf16.mxu1 %vm2291_vm11, %v2263_v5 }
 0x644   : > { %v2226_v43 = vadd.f32 %v4015_v12, %v3609_v56  ;;  %v2217_v45 = vpop.f32.mrb[75].mxu0  ;;  %4029 = vmatmul.mubr.msk.bf16.gmra.mrb[68].mxu1 %vm2291_vm11, %v2264_v4  ;;  %v2255_v19 = vmax.f32 %v2223_v9, 0.0 }
 0x645   : > { %v2218_v47 = vadd.f32 %v3609_v56, %v2217_v45  ;;  %v2253_v20 = vmax.f32 %v2215_v11, 0.0 }
 0x646   : > { %v2256_v13 = vmax.f32 %v2226_v43, 0.0 }
 0x647   : > { %v2254_v21 = vmax.f32 %v2218_v47, 0.0 }
 0x648   : > { %v2266_v22 = vpack.c.bf16 %v2256_v13, %v2255_v19 }
 0x649   : > { %v2265_v14 = vpack.c.bf16 %v2254_v21, %v2253_v20  ;;  %v4018_v15 = vpop.f32.mrb[76].mxu0 }
 0x64a   : > { %v2239_v16 = vadd.f32 %v4018_v15, %v3609_v56  ;;  %v2230_v61 = vpop.f32.mrb[77].mxu0 }
 0x64b   : > { %v2231_v17 = vadd.f32 %v3609_v56, %v2230_v61  ;;  %v4019_v50 = vpop.f32.mrb[78].mxu0  ;;  %4032 = vmatprep.mubr.msk.bf16.mxu1 %vm2291_vm11, %v2265_v14 }
 0x64c   : > { %v2242_v52 = vadd.f32 %v4019_v50, %v3609_v56  ;;  %v2233_v18 = vpop.f32.mrb[79].mxu0  ;;  %4033 = vmatmul.mubr.msk.bf16.gmra.mrb[72].mxu1 %vm2291_vm11, %v2266_v22  ;;  %v2259_v26 = vmax.f32 %v2239_v16, 0.0 }
 0x64d   : > { %v2234_v25 = vadd.f32 %v3609_v56, %v2233_v18  ;;  %v2257_v53 = vmax.f32 %v2231_v17, 0.0 }
 0x64e   : > { %v2260_v23 = vmax.f32 %v2242_v52, 0.0 }
 0x64f   : > { %v2258_v59 = vmax.f32 %v2234_v25, 0.0 }
 0x650   : > { %v2268_v24 = vpack.c.bf16 %v2260_v23, %v2259_v26 }
 0x651   : > { %v2267_v27 = vpack.c.bf16 %v2258_v59, %v2257_v53 }
 0x653   : > { %4036 = vmatprep.mubr.msk.bf16.mxu1 %vm2291_vm11, %v2267_v27 }
 0x654   : > { %4037 = vmatmul.mubr.msk.bf16.gmra.mrb[76].mxu1 %vm2291_vm11, %v2268_v24  ;;  %v4181_v24 = vld [vmem:[%s4781_s6 + $0x20] sm:$0xff]  }
 0x655   : > { %4048 = vmatprep.mubr.msk.bf16.mxu1 %vm4197_vm0, %v4196_v0 }
 0x70f   : > { %v4026_v30 = vpop.f32.mrb[64].mxu1 }
 0x710   : > { %v2359_v56 = vadd.f32 %v4026_v30, %v4604_v28  ;;  %v2350_v32 = vpop.f32.mrb[65].mxu1 }
 0x711   : > { %v2351_v34 = vadd.f32 %v4604_v28, %v2350_v32  ;;  %v4027_v36 = vpop.f32.mrb[66].mxu1 }
 0x712   : > { %v2362_v37 = vadd.f32 %v4027_v36, %v4604_v28  ;;  %v2353_v38 = vpop.f32.mrb[67].mxu1  ;;  %v2415_v40 = vmax.f32 %v2359_v56, 0.0 }
 0x713   : > { %v2354_v39 = vadd.f32 %v4604_v28, %v2353_v38  ;;  %v2413_v42 = vmax.f32 %v2351_v34, 0.0 }
 0x714   : > { %v2416_v41 = vmax.f32 %v2362_v37, 0.0 }
 0x715   : > { %v2414_v44 = vmax.f32 %v2354_v39, 0.0 }
 0x716   : > { %v2430_v46 = vpack.c.bf16 %v2416_v41, %v2415_v40 }
 0x717   : > { %v2429_v49 = vpack.c.bf16 %v2414_v44, %v2413_v42  ;;  %v4030_v51 = vpop.f32.mrb[68].mxu1 }
 0x718   : > { %v2375_v54 = vadd.f32 %v4030_v51, %v4604_v28  ;;  %v2366_v58 = vpop.f32.mrb[69].mxu1  ;;  %4047 = vmatpush3.bf16.msra.mxu1 %v2430_v46 }
 0x719   : > { %v2367_v62 = vadd.f32 %v4604_v28, %v2366_v58  ;;  %v4031_v63 = vpop.f32.mrb[70].mxu1  ;;  %4041 = vmatpush3.bf16.msra.mxu0 %v2429_v49  ;;  %4058 = vmatprep.subr.bf16.mxu1 %v4196_v0 }
 0x71a   : > { %v2378_v1 = vadd.f32 %v4031_v63, %v4604_v28  ;;  %v2369_v2 = vpop.f32.mrb[71].mxu1  ;;  %4052 = vmatprep.subr.bf16.mxu0 %v4196_v0  ;;  %v2419_v7 = vmax.f32 %v2375_v54, 0.0 }
 0x71b   : > { %v2370_v3 = vadd.f32 %v4604_v28, %v2369_v2  ;;  %4049 = vmatmul.mubr.msk.bf16.vlgmr.msra.gmra.mrb[80].mxu1 %vm935_vm3, %v4488_v29  ;;  %v2417_v5 = vmax.f32 %v2367_v62, 0.0 }
 0x71c   : > { %v2420_v4 = vmax.f32 %v2378_v1, 0.0  ;;  %4043 = vmatmul.mubr.msk.bf16.vlgmr.msra.gmra.mrb[80].mxu0 %vm935_vm3, %v4445_v55  ;;  %4060 = vmatprep.mubr.msk.bf16.mxu1 %vm4197_vm0, %v4196_v0 }
 0x71d   : > { %v2418_v8 = vmax.f32 %v2370_v3, 0.0  ;;  %4054 = vmatprep.mubr.msk.bf16.mxu0 %vm4197_vm0, %v4196_v0 }
 0x71e   : > { %v2432_v9 = vpack.c.bf16 %v2420_v4, %v2419_v7 }
 0x71f   : > { %v2431_v10 = vpack.c.bf16 %v2418_v8, %v2417_v5  ;;  %v4034_v11 = vpop.f32.mrb[72].mxu1 }
 0x720   : > { %v2391_v12 = vadd.f32 %v4034_v11, %v4604_v28  ;;  %v2382_v43 = vpop.f32.mrb[73].mxu1  ;;  %4059 = vmatpush3.bf16.msra.mxu1 %v2432_v9 }
 0x721   : > { %v2383_v29 = vadd.f32 %v4604_v28, %v2382_v43  ;;  %v4035_v45 = vpop.f32.mrb[74].mxu1  ;;  %4053 = vmatpush3.bf16.msra.mxu0 %v2431_v10  ;;  %4070 = vmatprep.subr.bf16.mxu1 %v4196_v0 }
 0x722   : > { %v2394_v55 = vadd.f32 %v4035_v45, %v4604_v28  ;;  %v2385_v47 = vpop.f32.mrb[75].mxu1  ;;  %4064 = vmatprep.subr.bf16.mxu0 %v4196_v0  ;;  %v2423_v13 = vmax.f32 %v2391_v12, 0.0 }
 0x723   : > { %v2386_v19 = vadd.f32 %v4604_v28, %v2385_v47  ;;  %4061 = vmatmul.mubr.msk.bf16.vlgmr.msra.gmra.mrb[84].mxu1 %vm935_vm3, %v4497_v31  ;;  %v2421_v21 = vmax.f32 %v2383_v29, 0.0 }
 0x724   : > { %v2424_v20 = vmax.f32 %v2394_v55, 0.0  ;;  %4055 = vmatmul.mubr.msk.bf16.vlgmr.msra.gmra.mrb[84].mxu0 %vm935_vm3, %v4454_v57  ;;  %4072 = vmatprep.mubr.msk.bf16.mxu1 %vm4197_vm0, %v4196_v0 }
 0x725   : > { %v2422_v22 = vmax.f32 %v2386_v19, 0.0  ;;  %4066 = vmatprep.mubr.msk.bf16.mxu0 %vm4197_vm0, %v4196_v0 }
 0x726   : > { %v2434_v14 = vpack.c.bf16 %v2424_v20, %v2423_v13  ;;  %v4183_v13 = vld [vmem:[%s4781_s6 + $0x30] sm:$0xff]   ;;  %v4184_v20 = vld [vmem:[%s4781_s6 + $0x38] sm:$0xff]  }
 0x727   : > { %v2433_v15 = vpack.c.bf16 %v2422_v22, %v2421_v21  ;;  %v4038_v16 = vpop.f32.mrb[76].mxu1  ;;  %v3645_v21 = vld [vmem:[%s4782_s7 + $0x2] ss:$0 sm:$0xff] }
 0x728   : > { %v2407_v61 = vadd.f32 %v4038_v16, %v4604_v28  ;;  %v2398_v17 = vpop.f32.mrb[77].mxu1  ;;  %4071 = vmatpush3.bf16.msra.mxu1 %v2434_v14 }
 0x729   : > { %v2399_v31 = vadd.f32 %v4604_v28, %v2398_v17  ;;  %v4039_v50 = vpop.f32.mrb[78].mxu1  ;;  %4065 = vmatpush3.bf16.msra.mxu0 %v2433_v15  ;;  %4082 = vmatprep.subr.bf16.mxu1 %v4196_v0 }
 0x72a   : > { %v2410_v57 = vadd.f32 %v4039_v50, %v4604_v28  ;;  %v2401_v52 = vpop.f32.mrb[79].mxu1  ;;  %4076 = vmatprep.subr.bf16.mxu0 %v4196_v0  ;;  %v2427_v25 = vmax.f32 %v2407_v61, 0.0 }
 0x72b   : > { %v2402_v18 = vadd.f32 %v4604_v28, %v2401_v52  ;;  %4073 = vmatmul.mubr.msk.bf16.vlgmr.msra.gmra.mrb[88].mxu1 %vm935_vm3, %v4506_v33  ;;  %v2425_v23 = vmax.f32 %v2399_v31, 0.0 }
 0x72c   : > { %v2428_v26 = vmax.f32 %v2410_v57, 0.0  ;;  %4067 = vmatmul.mubr.msk.bf16.vlgmr.msra.gmra.mrb[88].mxu0 %vm935_vm3, %v4463_v6  ;;  %4084 = vmatprep.mubr.msk.bf16.mxu1 %vm4197_vm0, %v4196_v0  ;;  %v4182_v6 = vld [vmem:[%s4781_s6 + $0x28] sm:$0xff]  }
 0x72d   : > { %v2426_v53 = vmax.f32 %v2402_v18, 0.0  ;;  %4078 = vmatprep.mubr.msk.bf16.mxu0 %vm4197_vm0, %v4196_v0 }
 0x72e   : > { %v2436_v59 = vpack.c.bf16 %v2428_v26, %v2427_v25 }
 0x72f   : > { %v2435_v27 = vpack.c.bf16 %v2426_v53, %v2425_v23 }
 0x730   : > { %4083 = vmatpush3.bf16.msra.mxu1 %v2436_v59  ;;  %v4185_v59 = vld [vmem:[%s4783_s8] sm:$0xff]  }
 0x731   : > { %4077 = vmatpush3.bf16.msra.mxu0 %v2435_v27  ;;  %4108 = vmatprep.subr.bf16.mxu1 %v4183_v13 }
 0x732   : > { %4088 = vmatprep.subr.bf16.mxu0 %v4181_v24 }
 0x733   : > { %4085 = vmatmul.mubr.msk.bf16.vlgmr.msra.gmra.mrb[92].mxu1 %vm935_vm3, %v4514_v35 }
 0x734   : > { %4079 = vmatmul.mubr.msk.bf16.vlgmr.msra.gmra.mrb[92].mxu0 %vm935_vm3, %v4472_v60  ;;  %4109 = vmatpush3.bf16.msra.mxu1 %v4183_v13  ;;  %v4706_v13 = vld [vmem:[%s4782_s7 + $0x3] ss:$0 sm:$0xff] }
 0x735   : > { %4089 = vmatpush3.bf16.msra.mxu0 %v4181_v24  ;;  %4110 = vmatprep.subr.bf16.mxu1 %v4184_v20 }
 0x736   : > { %4090 = vmatprep.subr.bf16.mxu0 %v4182_v6 }
 0x738   : > { %4111 = vmatpush3.bf16.msra.mxu1 %v4184_v20 }
 0x739   : > { %4091 = vmatpush3.bf16.msra.mxu0 %v4182_v6  ;;  %4134 = vmatprep.subr.bf16.mxu1 %v4196_v0 }
 0x73a   : > { %4128 = vmatprep.subr.bf16.mxu0 %v4196_v0 }
 0x7ee   : > { %v2512_v33 = vpop.f32.mrb[80].mxu1 }
 0x7ef   : > { %v2471_v28 = vpop.f32.mrb[80].mxu0  ;;  %v4050_v30 = vpop.f32.mrb[81].mxu1 }
 0x7f0   : > { %v4044_v56 = vpop.f32.mrb[81].mxu0  ;;  %v2515_v32 = vpop.f32.mrb[82].mxu1 }
 0x7f1   : > { %v2474_v34 = vpop.f32.mrb[82].mxu0  ;;  %v2766_v36 = vpack.c.bf16 %v2515_v32, %v2512_v33  ;;  %v4051_v35 = vpop.f32.mrb[83].mxu1 }
 0x7f2   : > { %v2765_v37 = vpack.c.bf16 %v2474_v34, %v2471_v28  ;;  %v4045_v38 = vpop.f32.mrb[83].mxu0 }
 0x7f4   : > { %4092 = vmatprep.mubr.msk.bf16.mxu0 %vm2291_vm11, %v2765_v37 }
 0x7f5   : > { %4093 = vmatmul.mubr.msk.bf16.vlgmr.msra.gmra.mrb[96].mxu0 %vm2291_vm11, %v2766_v36 }
 0x7f6   : > { %v2594_v60 = vpop.f32.mrb[84].mxu1 }
 0x7f7   : > { %v2553_v39 = vpop.f32.mrb[84].mxu0  ;;  %v4062_v40 = vpop.f32.mrb[85].mxu1 }
 0x7f8   : > { %v4056_v41 = vpop.f32.mrb[85].mxu0  ;;  %v2597_v42 = vpop.f32.mrb[86].mxu1 }
 0x7f9   : > { %v2556_v44 = vpop.f32.mrb[86].mxu0  ;;  %v2768_v46 = vpack.c.bf16 %v2597_v42, %v2594_v60  ;;  %v4063_v49 = vpop.f32.mrb[87].mxu1 }
 0x7fa   : > { %v2767_v51 = vpack.c.bf16 %v2556_v44, %v2553_v39  ;;  %v4057_v54 = vpop.f32.mrb[87].mxu0 }
 0x7fc   : > { %4096 = vmatprep.mubr.msk.bf16.mxu0 %vm2291_vm11, %v2767_v51 }
 0x7fd   : > { %4097 = vmatmul.mubr.msk.bf16.gmra.mrb[100].mxu0 %vm2291_vm11, %v2768_v46 }
 0x7fe   : > { %v2676_v58 = vpop.f32.mrb[88].mxu1 }
 0x7ff   : > { %v2635_v62 = vpop.f32.mrb[88].mxu0  ;;  %v4074_v63 = vpop.f32.mrb[89].mxu1 }
 0x800   : > { %v4068_v1 = vpop.f32.mrb[89].mxu0  ;;  %v2679_v2 = vpop.f32.mrb[90].mxu1 }
 0x801   : > { %v2638_v3 = vpop.f32.mrb[90].mxu0  ;;  %v2770_v7 = vpack.c.bf16 %v2679_v2, %v2676_v58  ;;  %v4075_v4 = vpop.f32.mrb[91].mxu1 }
 0x802   : > { %v2769_v5 = vpack.c.bf16 %v2638_v3, %v2635_v62  ;;  %v4069_v8 = vpop.f32.mrb[91].mxu0 }
 0x804   : > { %4100 = vmatprep.mubr.msk.bf16.mxu0 %vm2291_vm11, %v2769_v5 }
 0x805   : > { %4101 = vmatmul.mubr.msk.bf16.gmra.mrb[104].mxu0 %vm2291_vm11, %v2770_v7 }
 0x806   : > { %v2758_v9 = vpop.f32.mrb[92].mxu1 }
 0x807   : > { %v2717_v10 = vpop.f32.mrb[92].mxu0  ;;  %v4086_v11 = vpop.f32.mrb[93].mxu1 }
 0x808   : > { %v4080_v12 = vpop.f32.mrb[93].mxu0  ;;  %v2761_v43 = vpop.f32.mrb[94].mxu1 }
 0x809   : > { %v2720_v29 = vpop.f32.mrb[94].mxu0  ;;  %v2772_v45 = vpack.c.bf16 %v2761_v43, %v2758_v9  ;;  %v4087_v55 = vpop.f32.mrb[95].mxu1 }
 0x80a   : > { %v2771_v47 = vpack.c.bf16 %v2720_v29, %v2717_v10  ;;  %v4081_v19 = vpop.f32.mrb[95].mxu0 }
 0x80b   : > { %v4186_v19 = vld [vmem:[%s4783_s8 + $0x8] sm:$0xff]  }
 0x80c   : > { %4104 = vmatprep.mubr.msk.bf16.mxu0 %vm2291_vm11, %v2771_v47  ;;  %v3295_v47 = vpack.c.b16 %v4571_v48, %v4571_v48  ;;  %4129 = vmatpush3.bf16.msra.mxu0 %v4186_v19 }
 0x80d   : > { %4105 = vmatmul.mubr.msk.bf16.gmra.mrb[108].mxu0 %vm2291_vm11, %v2772_v45  ;;  %4140 = vmatprep.subr.bf16.mxu0 %v4196_v0 }
 0x80e   : > { %4130 = vmatprep.mubr.msk.bf16.mxu0 %vm4197_vm0, %v4196_v0 }
 0x8c8   : > { %v4094_v22 = vpop.f32.mrb[96].mxu0 }
 0x8c9   : > { %v2862_v14 = vadd.f32 %v4094_v22, %v3645_v21  ;;  %v2853_v15 = vpop.f32.mrb[97].mxu0 }
 0x8ca   : > { %v2854_v16 = vadd.f32 %v3645_v21, %v2853_v15  ;;  %v4095_v61 = vpop.f32.mrb[98].mxu0 }
 0x8cb   : > { %v2865_v17 = vadd.f32 %v4095_v61, %v3645_v21  ;;  %v2856_v31 = vpop.f32.mrb[99].mxu0  ;;  %v2918_v57 = vmax.f32 %v2862_v14, 0.0 }
 0x8cc   : > { %v2857_v50 = vadd.f32 %v3645_v21, %v2856_v31  ;;  %v2916_v18 = vmax.f32 %v2854_v16, 0.0 }
 0x8cd   : > { %v2919_v52 = vmax.f32 %v2865_v17, 0.0 }
 0x8ce   : > { %v2917_v25 = vmax.f32 %v2857_v50, 0.0 }
 0x8cf   : > { %v2933_v26 = vpack.c.bf16 %v2919_v52, %v2918_v57 }
 0x8d0   : > { %v2932_v23 = vpack.c.bf16 %v2917_v25, %v2916_v18  ;;  %v4098_v53 = vpop.f32.mrb[100].mxu0 }
 0x8d1   : > { %v2878_v24 = vadd.f32 %v4098_v53, %v3645_v21  ;;  %v2869_v27 = vpop.f32.mrb[101].mxu0 }
 0x8d2   : > { %v2870_v6 = vadd.f32 %v3645_v21, %v2869_v27  ;;  %v4099_v33 = vpop.f32.mrb[102].mxu0  ;;  %4112 = vmatprep.mubr.msk.bf16.mxu1 %vm2291_vm11, %v2932_v23 }
 0x8d3   : > { %v2881_v28 = vadd.f32 %v4099_v33, %v3645_v21  ;;  %v2872_v30 = vpop.f32.mrb[103].mxu0  ;;  %4113 = vmatmul.mubr.msk.bf16.vlgmr.msra.gmra.mrb[96].mxu1 %vm2291_vm11, %v2933_v26  ;;  %v2922_v32 = vmax.f32 %v2878_v24, 0.0 }
 0x8d4   : > { %v2873_v56 = vadd.f32 %v3645_v21, %v2872_v30  ;;  %4135 = vmatpush3.bf16.msra.mxu1 %v4185_v59  ;;  %v2920_v36 = vmax.f32 %v2870_v6, 0.0 }
 0x8d5   : > { %v2923_v34 = vmax.f32 %v2881_v28, 0.0 }
 0x8d6   : > { %v2921_v35 = vmax.f32 %v2873_v56, 0.0 }
 0x8d7   : > { %v2935_v37 = vpack.c.bf16 %v2923_v34, %v2922_v32 }
 0x8d8   : > { %v2934_v38 = vpack.c.bf16 %v2921_v35, %v2920_v36  ;;  %v4102_v60 = vpop.f32.mrb[104].mxu0 }
 0x8d9   : > { %v2894_v39 = vadd.f32 %v4102_v60, %v3645_v21  ;;  %v2885_v40 = vpop.f32.mrb[105].mxu0 }
 0x8da   : > { %v2886_v41 = vadd.f32 %v3645_v21, %v2885_v40  ;;  %v4103_v42 = vpop.f32.mrb[106].mxu0  ;;  %4116 = vmatprep.mubr.msk.bf16.mxu1 %vm2291_vm11, %v2934_v38 }
 0x8db   : > { %v2897_v44 = vadd.f32 %v4103_v42, %v3645_v21  ;;  %v2888_v46 = vpop.f32.mrb[107].mxu0  ;;  %4117 = vmatmul.mubr.msk.bf16.gmra.mrb[100].mxu1 %vm2291_vm11, %v2935_v37  ;;  %v2926_v51 = vmax.f32 %v2894_v39, 0.0 }
 0x8dc   : > { %v2889_v49 = vadd.f32 %v3645_v21, %v2888_v46  ;;  %v2924_v58 = vmax.f32 %v2886_v41, 0.0 }
 0x8dd   : > { %v2927_v54 = vmax.f32 %v2897_v44, 0.0 }
 0x8de   : > { %v2925_v62 = vmax.f32 %v2889_v49, 0.0 }
 0x8df   : > { %v2937_v63 = vpack.c.bf16 %v2927_v54, %v2926_v51 }
 0x8e0   : > { %v2936_v1 = vpack.c.bf16 %v2925_v62, %v2924_v58  ;;  %v4106_v2 = vpop.f32.mrb[108].mxu0 }
 0x8e1   : > { %v2910_v3 = vadd.f32 %v4106_v2, %v3645_v21  ;;  %v2901_v7 = vpop.f32.mrb[109].mxu0 }
 0x8e2   : > { %v2902_v4 = vadd.f32 %v3645_v21, %v2901_v7  ;;  %v4107_v5 = vpop.f32.mrb[110].mxu0  ;;  %4120 = vmatprep.mubr.msk.bf16.mxu1 %vm2291_vm11, %v2936_v1 }
 0x8e3   : > { %v2913_v8 = vadd.f32 %v4107_v5, %v3645_v21  ;;  %v2904_v9 = vpop.f32.mrb[111].mxu0  ;;  %4121 = vmatmul.mubr.msk.bf16.gmra.mrb[104].mxu1 %vm2291_vm11, %v2937_v63  ;;  %v2930_v11 = vmax.f32 %v2910_v3, 0.0 }
 0x8e4   : > { %v2905_v10 = vadd.f32 %v3645_v21, %v2904_v9  ;;  %v2928_v43 = vmax.f32 %v2902_v4, 0.0 }
 0x8e5   : > { %v2931_v12 = vmax.f32 %v2913_v8, 0.0 }
 0x8e6   : > { %v2929_v29 = vmax.f32 %v2905_v10, 0.0 }
 0x8e7   : > { %v2939_v45 = vpack.c.bf16 %v2931_v12, %v2930_v11 }
 0x8e8   : > { %v2938_v55 = vpack.c.bf16 %v2929_v29, %v2928_v43 }
 0x8ea   : > { %4124 = vmatprep.mubr.msk.bf16.mxu1 %vm2291_vm11, %v2938_v55 }
 0x8eb   : > { %4125 = vmatmul.mubr.msk.bf16.gmra.mrb[108].mxu1 %vm2291_vm11, %v2939_v45 }
 0x8ec   : > { %4136 = vmatprep.mubr.msk.bf16.mxu1 %vm4197_vm0, %v4196_v0 }
 0x8f3   : > { %4137 = vmatmul.mubr.msk.bf16.vlgmr.msra.gmra.mrb[112].mxu1 %vm935_vm3, %v3295_v47 }
 0x9a6   : > { %v4114_v20 = vpop.f32.mrb[96].mxu1 }
 0x9a7   : > { %v3029_v21 = vadd.f32 %v4114_v20, %v4706_v13  ;;  %v3020_v22 = vpop.f32.mrb[97].mxu1 }
 0x9a8   : > { %v3021_v48 = vadd.f32 %v4706_v13, %v3020_v22  ;;  %v4115_v14 = vpop.f32.mrb[98].mxu1 }
 0x9a9   : > { %v3085_v15 = vmax.f32 %v3029_v21, 0.0  ;;  %v3032_v16 = vadd.f32 %v4115_v14, %v4706_v13  ;;  %v3023_v61 = vpop.f32.mrb[99].mxu1 }
 0x9aa   : > { %v3083_v17 = vmax.f32 %v3021_v48, 0.0  ;;  %v3024_v31 = vadd.f32 %v4706_v13, %v3023_v61 }
 0x9ab   : > { %v3086_v50 = vmax.f32 %v3032_v16, 0.0  ;;  %v3108_v52 = vsel %vm935_vm3, %v3085_v15, 0.0 }
 0x9ac   : > { %v3084_v57 = vmax.f32 %v3024_v31, 0.0  ;;  %v3099_v25 = vsel %vm935_vm3, %v3083_v17, 0.0 }
 0x9ad   : > { %v3109_v18 = vsel %vm935_vm3, %v3086_v50, 0.0 }
 0x9ae   : > { %v3110_v26 = vadd.f32 %v3109_v18, %v3108_v52  ;;  %v3100_v23 = vsel %vm935_vm3, %v3084_v57, 0.0  ;;  %v4118_v53 = vpop.f32.mrb[100].mxu1 }
 0x9af   : > { %v3101_v59 = vadd.f32 %v3100_v23, %v3099_v25  ;;  %v3045_v24 = vadd.f32 %v4118_v53, %v4706_v13  ;;  %v3036_v27 = vpop.f32.mrb[101].mxu1 }
 0x9b0   : > { %v3111_v6 = vrot.slane %v3110_v26, 4  ;;  %v3037_v33 = vadd.f32 %v4706_v13, %v3036_v27  ;;  %v4119_v28 = vpop.f32.mrb[102].mxu1 }
 0x9b1   : > { %v3102_v30 = vrot.slane %v3101_v59, 4  ;;  %v3089_v56 = vmax.f32 %v3045_v24, 0.0  ;;  %v3048_v32 = vadd.f32 %v4119_v28, %v4706_v13  ;;  %v3039_v34 = vpop.f32.mrb[103].mxu1 }
 0x9b2   : > { %v3112_v36 = vadd.f32 %v3111_v6, %v3110_v26  ;;  %v3087_v35 = vmax.f32 %v3037_v33, 0.0  ;;  %v3040_v37 = vadd.f32 %v4706_v13, %v3039_v34 }
 0x9b3   : > { %v3103_v38 = vadd.f32 %v3102_v30, %v3101_v59  ;;  %v3090_v60 = vmax.f32 %v3048_v32, 0.0  ;;  %v3126_v42 = vsel %vm935_vm3, %v3089_v56, 0.0 }
 0x9b4   : > { %v3113_v39 = vrot.slane %v3112_v36, 2  ;;  %v3088_v40 = vmax.f32 %v3040_v37, 0.0  ;;  %v3117_v49 = vsel %vm935_vm3, %v3087_v35, 0.0 }
 0x9b5   : > { %v3104_v41 = vrot.slane %v3103_v38, 2  ;;  %v3127_v44 = vsel %vm935_vm3, %v3090_v60, 0.0 }
 0x9b6   : > { %v3114_v46 = vadd.f32 %v3113_v39, %v3112_v36  ;;  %v3128_v51 = vadd.f32 %v3127_v44, %v3126_v42  ;;  %v3118_v54 = vsel %vm935_vm3, %v3088_v40, 0.0  ;;  %v4122_v58 = vpop.f32.mrb[104].mxu1 }
 0x9b7   : > { %v3105_v62 = vadd.f32 %v3104_v41, %v3103_v38  ;;  %v3119_v63 = vadd.f32 %v3118_v54, %v3117_v49  ;;  %v3061_v1 = vadd.f32 %v4122_v58, %v4706_v13  ;;  %v3052_v2 = vpop.f32.mrb[105].mxu1 }
 0x9b8   : > { %v3115_v3 = vrot.slane %v3114_v46, 1  ;;  %v3129_v7 = vrot.slane %v3128_v51, 4  ;;  %v3053_v4 = vadd.f32 %v4706_v13, %v3052_v2  ;;  %v4123_v5 = vpop.f32.mrb[106].mxu1 }
 0x9b9   : > { %v3106_v8 = vrot.slane %v3105_v62, 1  ;;  %v3120_v9 = vrot.slane %v3119_v63, 4  ;;  %v3093_v10 = vmax.f32 %v3061_v1, 0.0  ;;  %v3064_v11 = vadd.f32 %v4123_v5, %v4706_v13  ;;  %v3055_v12 = vpop.f32.mrb[107].mxu1 }
 0x9ba   : > { %v3116_v43 = vadd.f32 %v3115_v3, %v3114_v46  ;;  %v3130_v29 = vadd.f32 %v3129_v7, %v3128_v51  ;;  %v3091_v45 = vmax.f32 %v3053_v4, 0.0  ;;  %v3056_v55 = vadd.f32 %v4706_v13, %v3055_v12 }
 0x9bb   : > { %v3107_v47 = vadd.f32 %v3106_v8, %v3105_v62  ;;  %v3121_v19 = vadd.f32 %v3120_v9, %v3119_v63  ;;  %v3094_v20 = vmax.f32 %v3064_v11, 0.0  ;;  %v3144_v48 = vsel %vm935_vm3, %v3093_v10, 0.0 }
 0x9bc   : > { %v3182_v21 = vpack.c.bf16 %v3116_v43, %v3116_v43  ;;  %v3131_v22 = vrot.slane %v3130_v29, 2  ;;  %v3092_v14 = vmax.f32 %v3056_v55, 0.0  ;;  %v3135_v61 = vsel %vm935_vm3, %v3091_v45, 0.0 }
 0x9bd   : > { %v3181_v15 = vpack.c.bf16 %v3107_v47, %v3107_v47  ;;  %v3122_v16 = vrot.slane %v3121_v19, 2  ;;  %v3145_v17 = vsel %vm935_vm3, %v3094_v20, 0.0 }
 0x9be   : > { %v3201_v31 = vunpack.c.l.b16 %v3182_v21  ;;  %v3132_v50 = vadd.f32 %v3131_v22, %v3130_v29  ;;  %v3146_v57 = vadd.f32 %v3145_v17, %v3144_v48  ;;  %v3136_v52 = vsel %vm935_vm3, %v3092_v14, 0.0  ;;  %v4126_v18 = vpop.f32.mrb[108].mxu1 }
 0x9bf   : > { %v3200_v25 = vunpack.c.l.b16 %v3181_v15  ;;  %v3123_v26 = vadd.f32 %v3122_v16, %v3121_v19  ;;  %v3137_v23 = vadd.f32 %v3136_v52, %v3135_v61  ;;  %v3077_v53 = vadd.f32 %v4126_v18, %v4706_v13  ;;  %v3068_v59 = vpop.f32.mrb[109].mxu1 }
 0x9c0   : > { %v3133_v24 = vrot.slane %v3132_v50, 1  ;;  %v3147_v27 = vrot.slane %v3146_v57, 4  ;;  %v3069_v6 = vadd.f32 %v4706_v13, %v3068_v59  ;;  %v4127_v33 = vpop.f32.mrb[110].mxu1 }
 0x9c1   : > { %v3209_v28 = vsel %vm3208_vm4, %v3201_v31, %v3200_v25  ;;  %v3124_v30 = vrot.slane %v3123_v26, 1  ;;  %v3138_v56 = vrot.slane %v3137_v23, 4  ;;  %v3097_v32 = vmax.f32 %v3077_v53, 0.0  ;;  %v3071_v34 = vpop.f32.mrb[111].mxu1 }
 0x9c2   : > { %v3134_v36 = vadd.f32 %v3133_v24, %v3132_v50  ;;  %v3148_v35 = vadd.f32 %v3147_v27, %v3146_v57  ;;  %v3095_v37 = vmax.f32 %v3069_v6, 0.0  ;;  %v3080_v38 = vadd.f32 %v4127_v33, %v4706_v13 }
 0x9c3   : > { %v3125_v60 = vadd.f32 %v3124_v30, %v3123_v26  ;;  %v3139_v39 = vadd.f32 %v3138_v56, %v3137_v23  ;;  %v3072_v40 = vadd.f32 %v4706_v13, %v3071_v34  ;;  %v3162_v58 = vsel %vm935_vm3, %v3097_v32, 0.0  ;;  %v3677_v56 = vld [vmem:[%s4784_s9] ss:$0 sm:$0xff] }
 0x9c4   : > { %v3184_v41 = vpack.c.bf16 %v3134_v36, %v3134_v36  ;;  %v3149_v42 = vrot.slane %v3148_v35, 2  ;;  %v3098_v44 = vmax.f32 %v3080_v38, 0.0  ;;  %v3153_v62 = vsel %vm935_vm3, %v3095_v37, 0.0 }
 0x9c5   : > { %v3183_v46 = vpack.c.bf16 %v3125_v60, %v3125_v60  ;;  %v3140_v49 = vrot.slane %v3139_v39, 2  ;;  %v3096_v51 = vmax.f32 %v3072_v40, 0.0  ;;  %v3683_v40 = vld [vmem:[%s4783_s8 + $0x18] sm:$0x1] }
 0x9c6   : > { %v3150_v54 = vadd.f32 %v3149_v42, %v3148_v35  ;;  %v3163_v63 = vsel %vm935_vm3, %v3098_v44, 0.0  ;;  %v3339_v1 = vpop.f32.mrb[112].mxu1  ;;  %v3203_v5 = vunpack.c.l.b16 %v3184_v41  ;;  %v3413_v41 = vunpack.c.l.bf16 %v3683_v40  ;;  %v3680_v44 = vld [vmem:[%s4784_s9 + $0x1] ss:$0 sm:$0xff] }
 0x9c7   : > { %v3202_v2 = vunpack.c.l.b16 %v3183_v46  ;;  %v3141_v3 = vadd.f32 %v3140_v49, %v3139_v39  ;;  %v3164_v7 = vadd.f32 %v3163_v63, %v3162_v58  ;;  %v3154_v4 = vsel %vm935_vm3, %v3096_v51, 0.0  ;;  %v4138_v13 = vpop.f32.mrb[113].mxu1 }
 0x9c8   : > { %v3151_v8 = vrot.slane %v3150_v54, 1  ;;  %v3155_v9 = vadd.f32 %v3154_v4, %v3153_v62  ;;  %v3342_v10 = vpop.f32.mrb[114].mxu1 }
 0x9c9   : > { %v3211_v11 = vsel %vm3210_vm5, %v3202_v2, %v3209_v28  ;;  %v3142_v12 = vrot.slane %v3141_v3, 1  ;;  %v3165_v43 = vrot.slane %v3164_v7, 4  ;;  %v4139_v29 = vpop.f32.mrb[115].mxu1  ;;  %v4187_v28 = vld [vmem:[%s4783_s8 + $0x10] sm:$0xff]  }
 0x9ca   : > { %v3152_v45 = vadd.f32 %v3151_v8, %v3150_v54  ;;  %v3213_v55 = vsel %vm3212_vm6, %v3203_v5, %v3211_v11  ;;  %v3156_v47 = vrot.slane %v3155_v9, 4 }
 0x9cb   : > { %v3143_v19 = vadd.f32 %v3142_v12, %v3141_v3  ;;  %v3166_v20 = vadd.f32 %v3165_v43, %v3164_v7  ;;  %v4198_v3 = vmov 0   ;;  %v3684_v7 = vld [vmem:[%s4784_s9 + $0x2] ss:$0 sm:$0xff] }
 0x9cc   : > { %v3186_v21 = vpack.c.bf16 %v3152_v45, %v3152_v45  ;;  %v3157_v22 = vadd.f32 %v3156_v47, %v3155_v9  ;;  %4159 = vset.pattern.permute.xlu0 %v4198_v3 }
 0x9cd   : > { %v3185_v48 = vpack.c.bf16 %v3143_v19, %v3143_v19  ;;  %v3167_v14 = vrot.slane %v3166_v20, 2 }
 0x9ce   : > { %v3158_v15 = vrot.slane %v3157_v22, 2  ;;  %v3205_v17 = vunpack.c.l.b16 %v3186_v21 }
 0x9cf   : > { %v3204_v16 = vunpack.c.l.b16 %v3185_v48  ;;  %v3168_v61 = vadd.f32 %v3167_v14, %v3166_v20 }
 0x9d0   : > { %v3159_v31 = vadd.f32 %v3158_v15, %v3157_v22 }
 0x9d1   : > { %v3215_v50 = vsel %vm3214_vm7, %v3204_v16, %v3213_v55  ;;  %v3169_v57 = vrot.slane %v3168_v61, 1 }
 0x9d2   : > { %v3160_v52 = vrot.slane %v3159_v31, 1  ;;  %v3217_v18 = vsel %vm3216_vm8, %v3205_v17, %v3215_v50 }
 0x9d3   : > { %v3170_v25 = vadd.f32 %v3169_v57, %v3168_v61 }
 0x9d4   : > { %v3161_v26 = vadd.f32 %v3160_v52, %v3159_v31 }
 0x9d5   : > { %v3188_v23 = vpack.c.bf16 %v3170_v25, %v3170_v25 }
 0x9d6   : > { %v3187_v53 = vpack.c.bf16 %v3161_v26, %v3161_v26 }
 0x9d7   : > { %v3207_v24 = vunpack.c.l.b16 %v3188_v23 }
 0x9d8   : > { %v3206_v59 = vunpack.c.l.b16 %v3187_v53 }
 0x9da   : > { %v3219_v27 = vsel %vm3218_vm9, %v3206_v59, %v3217_v18 }
 0x9db   : > { %v3221_v6 = vsel %vm3220_vm10, %v3207_v24, %v3219_v27 }
 0x9dc   : > { %v3222_v33 = vpack.c.b16 %v3221_v6, %v3221_v6 }
 0x9de   : > { %4131 = vmatmul.mubr.msk.bf16.vlgmr.msra.gmra.mrb[112].mxu0 %vm935_vm3, %v3222_v33 }
 0x9df   : > { %4142 = vmatprep.mubr.msk.bf16.mxu0 %vm4197_vm0, %v4196_v0  ;;  %4141 = vmatpush3.bf16.msra.mxu0 %v4187_v28  ;;  %v3414_v0 = vlaneseq }
 0x9e1   : > { %v3415_v39 = vshrl.u32 %v3414_v0, 7 }
 0x9e3   : > { %v3416_v42 = vsub.s32 0, %v3415_v39 }
 0x9e5   : > { %v3417_v54 = vrot.slane %v3413_v41, %v3416_v42 }
 0xab1   : > { %v3266_v30 = vpop.f32.mrb[112].mxu0 }
 0xab2   : > { %v3340_v32 = vadd.f32 %v3339_v1, %v3266_v30  ;;  %v4132_v34 = vpop.f32.mrb[113].mxu0 }
 0xab3   : > { %v3269_v36 = vpop.f32.mrb[114].mxu0 }
 0xab4   : > { %v3350_v35 = vadd.f32 %v3677_v56, %v3340_v32  ;;  %v4133_v37 = vpop.f32.mrb[115].mxu0 }
 0xab6   : > { %v3351_v38 = vmax.f32 %v3350_v35, 0.0 }
 0xab8   : > { %v3352_v60 = vpack.c.bf16 %v3351_v38, %v3351_v38 }
 0xaba   : > { %4143 = vmatmul.mubr.msk.bf16.vlgmr.msra.gmra.mrb[116].mxu0 %vm935_vm3, %v3352_v60 }
 0xb8d   : > { %v3404_v46 = vpop.f32.mrb[116].mxu0 }
 0xb8e   : > { %v3405_v49 = vadd.f32 %v3680_v44, %v3404_v46  ;;  %v4144_v51 = vpop.f32.mrb[117].mxu0 }
 0xb8f   : > { %v3407_v58 = vpop.f32.mrb[118].mxu0 }
 0xb90   : > { %v3410_v62 = vmax.f32 %v3405_v49, 0.0  ;;  %v4145_v63 = vpop.f32.mrb[119].mxu0 }
 0xb92   : > { %v3418_v1 = vmul.f32 %v3417_v54, %v3410_v62 }
 0xb94   : > { %v3419_v2 = vsel %vm449_vm2, %v3418_v1, 0.0 }
 0xb95   : > { %3420 = vadd.xlane.f32.xlu0 %v3419_v2 }
 0xc22   : > { %v3421_v4 = vpop.xlane.xlu0 %3420 }
 0xc23   : > { %v3427_v13 = vadd.f32 %v3684_v7, %v3421_v4 }
 0xc25   : > { %v3428_v5 = vmax.f32 %v3427_v13, 0.0 }
 0xc27   : > { %3431 = vperm.xlu0 %4159, %v3428_v5  }
 0xca6   : > { %v3432_v8 = vpop.permute.xlu0 %3431 }
 0xca7   : > { %3434 = vst [vmem:[%s431_s11] sm:$0xff] %v3432_v8 }
 0xca8 PF: > { %s20_s13 = sadd.s32 1, %s4194_s13  }
 0xca9   : > { %p17_p5 = scmp.ge.s32.totalorder %s20_s13, 4  }
 0xcab   :  { %19 = sbr.rel (!%p17_p5) target bundleno = 1 (0x1), region = 108 }

</bundles_post_ra>
